<compile_context>
chip_gen: v5e
topology: v5e:2x2
jax: 0.10.0
libtpu: 0.0.40
codegen_flags: <defaults>
</compile_context>

<pallas_src>
import math

import jax
import jax.numpy as jnp
from jax.experimental import pallas as pl
from jax.experimental.pallas import tpu as pltpu

ORDER = 3
REDUCTION = 4


def _round_up(x, m):
    return ((x + m - 1) // m) * m


def gcn_bi_forward(params, adj, features):
    """Fused GCN_bi forward: 3 x (GraphConvolution(order=3) + ReLU) in one call.

    `params` is a list of 3 per-layer dicts with keys:
        wcat  (in_features, 3*out)   concat of the 3 NGNN branch weights [W1|W2|W3]
        bcat  (1, 3*out)             concat of the 3 NGNN branch biases  [b1|b2|b3]
        fc1w  (out, out//reduction), fc1b (1, out//reduction)
        fc2w  (out//reduction, out), fc2b (1, out)
    Returns (out_d1, out_d2, out_d3), each (N, out).
    """
    n = features.shape[0]
    out_f = params[0]["fc2w"].shape[1]
    F = out_f
    total = ORDER * out_f
    padded_cols = _round_up(total, 128)      # lane-dense output slab width
    col_pad = padded_cols - total

    # Pad the node axis to a sublane multiple.  Padded adj rows/cols are zero,
    # so padded nodes never leak into real rows through adj @ h; the node-mean
    # inside the kernel is masked to the true node count.
    n_pad = _round_up(n, 8)
    row_pad = n_pad - n
    if row_pad:
        adj = jnp.pad(adj, ((0, row_pad), (0, row_pad)))
        features = jnp.pad(features, ((0, row_pad), (0, 0)))

    def reorder_wcat(wcat):
        # [W1|W2|W3] -> [W3|W2|W1]: the operands of the 2nd/3rd hop matmuls
        # become prefix (lane-0 aligned) slices of the running hop slab.
        return jnp.concatenate(
            [wcat[:, 2 * F:3 * F], wcat[:, F:2 * F], wcat[:, 0:F]], axis=1)

    def kernel(adj_ref, x_ref, *refs):
        out_ref = refs[-1]
        p = refs[:-1]                        # 18 param refs, 6 per layer

        # adj resident once for all 3 layers; bf16 for the MXU hop matmuls.
        adj16 = adj_ref[...].astype(jnp.bfloat16)

        if row_pad:
            row_ids = jax.lax.broadcasted_iota(jnp.int32, (n_pad, 1), 0)
            row_mask = (row_ids < n).astype(jnp.float32)
        inv_n = 1.0 / float(n)

        def layer(x_in, wcat_ref, bcat_ref, fc1w_ref, fc1b_ref,
                  fc2w_ref, fc2b_ref):
            bcat = bcat_ref[...]             # (1, 3F), layout [b1|b2|b3]

            # One wide weight matmul + tanh for all 3 branches: (N, 3F),
            # column layout [h3 | h2 | h1].  Kept in f32 (precision-sensitive
            # through tanh; not the dominant cost for realistic N >> F).
            h = jnp.tanh(jnp.dot(x_in, wcat_ref[...],
                                 preferred_element_type=jnp.float32))

            # Hop passes with narrowing width (3F -> 2F -> F), bf16 inputs,
            # f32 accumulation.  Each hop input is a prefix slice.
            a1 = jnp.dot(adj16, h.astype(jnp.bfloat16),
                         preferred_element_type=jnp.float32)        # (N, 3F)
            a2 = jnp.dot(adj16, a1[:, :2 * F].astype(jnp.bfloat16),
                         preferred_element_type=jnp.float32)        # (N, 2F)
            a3 = jnp.dot(adj16, a2[:, :F].astype(jnp.bfloat16),
                         preferred_element_type=jnp.float32)        # (N, F)

            # Branch outputs (bias added AFTER all hop propagations, as in NGNN).
            b1 = a1[:, 2 * F:3 * F] + bcat[:, 0:F]       # adj^1 @ tanh(xW1) + b1
            b2 = a2[:, F:2 * F] + bcat[:, F:2 * F]       # adj^2 @ tanh(xW2) + b2
            b3 = a3 + bcat[:, 2 * F:3 * F]               # adj^3 @ tanh(xW3) + b3

            # Per-order attention: one wide (masked) mean over the node axis.
            slab = jnp.concatenate([b1, b2, b3], axis=-1)            # (N, 3F)
            if row_pad:
                sums = jnp.sum(slab * row_mask, axis=0, keepdims=True)
            else:
                sums = jnp.sum(slab, axis=0, keepdims=True)
            means = sums * inv_n                                     # (1, 3F)
            feats_mean = jnp.concatenate(
                [means[:, 0:F], means[:, F:2 * F], means[:, 2 * F:3 * F]],
                axis=0)                                              # (3, F)

            # fc2(relu(fc1(.))), softmax over the 3 hop orders (dim 0).
            hmid = jnp.maximum(
                jnp.dot(feats_mean, fc1w_ref[...],
                        preferred_element_type=jnp.float32) + fc1b_ref[...],
                0.0)
            logits = jnp.dot(hmid, fc2w_ref[...],
                             preferred_element_type=jnp.float32) + fc2b_ref[...]
            zmax = jnp.max(logits, axis=0, keepdims=True)
            ez = jnp.exp(logits - zmax)
            attn = ez / jnp.sum(ez, axis=0, keepdims=True)           # (3, F)

            out = (b1 * attn[0:1, :] + b2 * attn[1:2, :] + b3 * attn[2:3, :])
            # trailing ReLU from GCN_bi (every GraphConvolution output is relu'd)
            return jnp.maximum(out, 0.0)

        d1 = layer(x_ref[...], *p[0:6])
        d2 = layer(d1, *p[6:12])
        d3 = layer(d2, *p[12:18])

        chunks = [d1, d2, d3]
        if col_pad > 0:
            chunks.append(jnp.zeros((n_pad, col_pad), jnp.float32))
        # Single lane-dense (N, padded) store: unmasked vst instead of three
        # 32-lane-wide masked stores.
        out_ref[...] = jnp.concatenate(chunks, axis=-1)

    flat_args = [adj, features]
    for lp in params:
        flat_args += [reorder_wcat(lp["wcat"]), lp["bcat"], lp["fc1w"],
                      lp["fc1b"], lp["fc2w"], lp["fc2b"]]

    vmem = pl.BlockSpec(memory_space=pltpu.MemorySpace.VMEM)
    slab = pl.pallas_call(
        kernel,
        out_shape=jax.ShapeDtypeStruct((n_pad, padded_cols), jnp.float32),
        in_specs=[vmem] * len(flat_args),
        out_specs=vmem,
        compiler_params=pltpu.CompilerParams(
            vmem_limit_bytes=48 * 1024 * 1024),
    )(*flat_args)

    return (slab[:n, 0:out_f],
            slab[:n, out_f:2 * out_f],
            slab[:n, 2 * out_f:3 * out_f])


def gcn_bi_reference(params, adj, features):
    """Pure-JAX f32 reference (matches the PyTorch module semantics)."""
    def graph_conv(p, x):
        F = p["fc2w"].shape[1]
        outs = []
        for k in range(ORDER):
            w = p["wcat"][:, k * F:(k + 1) * F]
            b = p["bcat"][:, k * F:(k + 1) * F]
            h = jnp.tanh(x @ w)
            for _ in range(k + 1):      # order = k+1 spmm passes
                h = adj @ h
            outs.append(h + b)
        feats_mean = jnp.concatenate(
            [jnp.mean(o, axis=0, keepdims=True) for o in outs], axis=0)
        hmid = jnp.maximum(feats_mean @ p["fc1w"] + p["fc1b"], 0.0)
        logits = hmid @ p["fc2w"] + p["fc2b"]
        attn = jax.nn.softmax(logits, axis=0)
        out = outs[0] * attn[0:1, :]
        for k in range(1, ORDER):
            out = out + outs[k] * attn[k:k + 1, :]
        return out

    d1 = jnp.maximum(graph_conv(params[0], features), 0.0)
    d2 = jnp.maximum(graph_conv(params[1], d1), 0.0)
    d3 = jnp.maximum(graph_conv(params[2], d2), 0.0)
    return d1, d2, d3


def init_graph_conv_params(key, in_features, out_features, reduction=REDUCTION):
    """Deterministic synthetic parameters matching GraphConvolution's shapes."""
    hid = out_features // reduction
    keys = jax.random.split(key, 10)
    xav = math.sqrt(6.0 / (in_features + out_features))     # xavier_uniform
    stdv = 1.0 / math.sqrt(out_features)
    ws = [jax.random.uniform(keys[i], (in_features, out_features),
                             jnp.float32, -xav, xav) for i in range(ORDER)]
    bs = [jax.random.uniform(keys[ORDER + i], (1, out_features),
                             jnp.float32, -stdv, stdv) for i in range(ORDER)]
    wcat = jnp.concatenate(ws, axis=1)        # (in, 3*out)
    bcat = jnp.concatenate(bs, axis=1)        # (1, 3*out)
    # nn.Linear weights stored pre-transposed for row-major x @ W
    bnd1 = 1.0 / math.sqrt(out_features)
    fc1w = jax.random.uniform(keys[6], (out_features, hid), jnp.float32, -bnd1, bnd1)
    fc1b = jax.random.uniform(keys[7], (1, hid), jnp.float32, -bnd1, bnd1)
    bnd2 = 1.0 / math.sqrt(hid)
    fc2w = jax.random.uniform(keys[8], (hid, out_features), jnp.float32, -bnd2, bnd2)
    fc2b = jax.random.uniform(keys[9], (1, out_features), jnp.float32, -bnd2, bnd2)
    return {"wcat": wcat, "bcat": bcat, "fc1w": fc1w, "fc1b": fc1b,
            "fc2w": fc2w, "fc2b": fc2b}


def gcn_bi_init(key, hidden_bi, output_bi):
    k1, k2, k3 = jax.random.split(key, 3)
    return [init_graph_conv_params(k1, hidden_bi, output_bi),
            init_graph_conv_params(k2, output_bi, output_bi),
            init_graph_conv_params(k3, output_bi, output_bi)]


if __name__ == "__main__":
    N = 16             # number of graph nodes
    HIDDEN_BI = 32     # input feature dim
    OUTPUT_BI = 32     # output feature dim (divisible by reduction=4)

    root = jax.random.PRNGKey(0)
    k_params, k_adj, k_feat = jax.random.split(root, 3)

    params = gcn_bi_init(k_params, HIDDEN_BI, OUTPUT_BI)

    # Dense, row-normalized adjacency with self-loops (stand-in for torch.spmm's
    # sparse adjacency).
    a = (jax.random.uniform(k_adj, (N, N), jnp.float32) < 0.3).astype(jnp.float32)
    a = a + jnp.eye(N, dtype=jnp.float32)
    adj = a / jnp.sum(a, axis=1, keepdims=True)

    features = jax.random.normal(k_feat, (N, HIDDEN_BI), jnp.float32)

    out_d1, out_d2, out_d3 = gcn_bi_forward(params, adj, features)
    jax.block_until_ready((out_d1, out_d2, out_d3))

    # Validate the bf16 adj@h path against the f32 pure-JAX reference.
    r1, r2, r3 = gcn_bi_reference(params, adj, features)
    for got, ref in ((out_d1, r1), (out_d2, r2), (out_d3, r3)):
        assert got.shape == (N, OUTPUT_BI)
        err = float(jnp.max(jnp.abs(got - ref)))
        assert jnp.allclose(got, ref, rtol=5e-2, atol=5e-2), err

    print("KERNEL_OK")
</pallas_src>

<mosaic_0001>
module attributes {stable_mosaic.version = 11 : i64} {
  func.func @kernel(%arg0: memref<16x16xf32, #tpu.memory_space<vmem>>, %arg1: memref<16x32xf32, #tpu.memory_space<vmem>>, %arg2: memref<32x96xf32, #tpu.memory_space<vmem>>, %arg3: memref<1x96xf32, #tpu.memory_space<vmem>>, %arg4: memref<32x8xf32, #tpu.memory_space<vmem>>, %arg5: memref<1x8xf32, #tpu.memory_space<vmem>>, %arg6: memref<8x32xf32, #tpu.memory_space<vmem>>, %arg7: memref<1x32xf32, #tpu.memory_space<vmem>>, %arg8: memref<32x96xf32, #tpu.memory_space<vmem>>, %arg9: memref<1x96xf32, #tpu.memory_space<vmem>>, %arg10: memref<32x8xf32, #tpu.memory_space<vmem>>, %arg11: memref<1x8xf32, #tpu.memory_space<vmem>>, %arg12: memref<8x32xf32, #tpu.memory_space<vmem>>, %arg13: memref<1x32xf32, #tpu.memory_space<vmem>>, %arg14: memref<32x96xf32, #tpu.memory_space<vmem>>, %arg15: memref<1x96xf32, #tpu.memory_space<vmem>>, %arg16: memref<32x8xf32, #tpu.memory_space<vmem>>, %arg17: memref<1x8xf32, #tpu.memory_space<vmem>>, %arg18: memref<8x32xf32, #tpu.memory_space<vmem>>, %arg19: memref<1x32xf32, #tpu.memory_space<vmem>>, %arg20: memref<16x128xf32, #tpu.memory_space<vmem>>) attributes {dimension_semantics = [], scalar_prefetch = 0 : i64, scratch_operands = 0 : i64, tpu.core_type = #tpu.core_type<tc>} {
    %c0 = arith.constant 0 : index
    %c0_0 = arith.constant 0 : index
    %0 = vector.load %arg0[%c0, %c0_0] : memref<16x16xf32, #tpu.memory_space<vmem>>, vector<16x16xf32>
    %1 = arith.truncf %0 : vector<16x16xf32> to vector<16x16xbf16>
    %c0_1 = arith.constant 0 : index
    %c0_2 = arith.constant 0 : index
    %2 = vector.load %arg1[%c0_1, %c0_2] : memref<16x32xf32, #tpu.memory_space<vmem>>, vector<16x32xf32>
    %c0_3 = arith.constant 0 : index
    %c0_4 = arith.constant 0 : index
    %3 = vector.load %arg3[%c0_3, %c0_4] : memref<1x96xf32, #tpu.memory_space<vmem>>, vector<1x96xf32>
    %c0_5 = arith.constant 0 : index
    %c0_6 = arith.constant 0 : index
    %4 = vector.load %arg2[%c0_5, %c0_6] : memref<32x96xf32, #tpu.memory_space<vmem>>, vector<32x96xf32>
    %cst = arith.constant dense<0.000000e+00> : vector<16x96xf32>
    %5 = tpu.matmul %2, %4, %cst {dimension_numbers = #tpu.dot_dimension_numbers<[1], [0], [0], [1], [0, 0, 1, 1], [], []>} : vector<16x32xf32>, vector<32x96xf32>, vector<16x96xf32> -> vector<16x96xf32>
    %6 = math.tanh %5 : vector<16x96xf32>
    %7 = arith.truncf %6 : vector<16x96xf32> to vector<16x96xbf16>
    %cst_7 = arith.constant dense<0.000000e+00> : vector<16x96xf32>
    %8 = tpu.matmul %1, %7, %cst_7 {dimension_numbers = #tpu.dot_dimension_numbers<[1], [0], [0], [1], [0, 0, 1, 1], [], []>} : vector<16x16xbf16>, vector<16x96xbf16>, vector<16x96xf32> -> vector<16x96xf32>
    %9 = vector.extract_strided_slice %8 {offsets = [0, 0], sizes = [16, 64], strides = [1, 1]} : vector<16x96xf32> to vector<16x64xf32>
    %10 = arith.truncf %9 : vector<16x64xf32> to vector<16x64xbf16>
    %cst_8 = arith.constant dense<0.000000e+00> : vector<16x64xf32>
    %11 = tpu.matmul %1, %10, %cst_8 {dimension_numbers = #tpu.dot_dimension_numbers<[1], [0], [0], [1], [0, 0, 1, 1], [], []>} : vector<16x16xbf16>, vector<16x64xbf16>, vector<16x64xf32> -> vector<16x64xf32>
    %12 = vector.extract_strided_slice %11 {offsets = [0, 0], sizes = [16, 32], strides = [1, 1]} : vector<16x64xf32> to vector<16x32xf32>
    %13 = arith.truncf %12 : vector<16x32xf32> to vector<16x32xbf16>
    %cst_9 = arith.constant dense<0.000000e+00> : vector<16x32xf32>
    %14 = tpu.matmul %1, %13, %cst_9 {dimension_numbers = #tpu.dot_dimension_numbers<[1], [0], [0], [1], [0, 0, 1, 1], [], []>} : vector<16x16xbf16>, vector<16x32xbf16>, vector<16x32xf32> -> vector<16x32xf32>
    %15 = vector.extract_strided_slice %8 {offsets = [0, 64], sizes = [16, 32], strides = [1, 1]} : vector<16x96xf32> to vector<16x32xf32>
    %16 = vector.extract_strided_slice %3 {offsets = [0, 0], sizes = [1, 32], strides = [1, 1]} : vector<1x96xf32> to vector<1x32xf32>
    %17 = vector.broadcast %16 : vector<1x32xf32> to vector<16x32xf32>
    %18 = arith.addf %15, %17 : vector<16x32xf32>
    %19 = vector.extract_strided_slice %11 {offsets = [0, 32], sizes = [16, 32], strides = [1, 1]} : vector<16x64xf32> to vector<16x32xf32>
    %20 = vector.extract_strided_slice %3 {offsets = [0, 32], sizes = [1, 32], strides = [1, 1]} : vector<1x96xf32> to vector<1x32xf32>
    %21 = vector.broadcast %20 : vector<1x32xf32> to vector<16x32xf32>
    %22 = arith.addf %19, %21 : vector<16x32xf32>
    %23 = vector.extract_strided_slice %3 {offsets = [0, 64], sizes = [1, 32], strides = [1, 1]} : vector<1x96xf32> to vector<1x32xf32>
    %24 = vector.broadcast %23 : vector<1x32xf32> to vector<16x32xf32>
    %25 = arith.addf %14, %24 : vector<16x32xf32>
    %26 = tpu.concatenate %18, %22, %25 in 1 : vector<16x32xf32>, vector<16x32xf32>, vector<16x32xf32> -> vector<16x96xf32>
    %cst_10 = arith.constant dense<0.000000e+00> : vector<96xf32>
    %27 = vector.multi_reduction <add>, %26, %cst_10 [0] : vector<16x96xf32> to vector<96xf32>
    %28 = vector.shape_cast %27 : vector<96xf32> to vector<1x96xf32>
    %cst_11 = arith.constant 6.250000e-02 : f32
    %29 = vector.broadcast %cst_11 : f32 to vector<1x96xf32>
    %30 = arith.mulf %28, %29 : vector<1x96xf32>
    %31 = vector.extract_strided_slice %30 {offsets = [0, 0], sizes = [1, 32], strides = [1, 1]} : vector<1x96xf32> to vector<1x32xf32>
    %32 = vector.extract_strided_slice %30 {offsets = [0, 32], sizes = [1, 32], strides = [1, 1]} : vector<1x96xf32> to vector<1x32xf32>
    %33 = vector.extract_strided_slice %30 {offsets = [0, 64], sizes = [1, 32], strides = [1, 1]} : vector<1x96xf32> to vector<1x32xf32>
    %34 = tpu.concatenate %31, %32, %33 in 0 : vector<1x32xf32>, vector<1x32xf32>, vector<1x32xf32> -> vector<3x32xf32>
    %c0_12 = arith.constant 0 : index
    %c0_13 = arith.constant 0 : index
    %35 = vector.load %arg4[%c0_12, %c0_13] : memref<32x8xf32, #tpu.memory_space<vmem>>, vector<32x8xf32>
    %cst_14 = arith.constant dense<0.000000e+00> : vector<3x8xf32>
    %36 = tpu.matmul %34, %35, %cst_14 {dimension_numbers = #tpu.dot_dimension_numbers<[1], [0], [0], [1], [0, 0, 1, 1], [], []>} : vector<3x32xf32>, vector<32x8xf32>, vector<3x8xf32> -> vector<3x8xf32>
    %c0_15 = arith.constant 0 : index
    %c0_16 = arith.constant 0 : index
    %37 = vector.load %arg5[%c0_15, %c0_16] : memref<1x8xf32, #tpu.memory_space<vmem>>, vector<1x8xf32>
    %38 = vector.broadcast %37 : vector<1x8xf32> to vector<3x8xf32>
    %39 = arith.addf %36, %38 : vector<3x8xf32>
    %cst_17 = arith.constant 0.000000e+00 : f32
    %40 = vector.broadcast %cst_17 : f32 to vector<3x8xf32>
    %41 = arith.maximumf %39, %40 : vector<3x8xf32>
    %c0_18 = arith.constant 0 : index
    %c0_19 = arith.constant 0 : index
    %42 = vector.load %arg6[%c0_18, %c0_19] : memref<8x32xf32, #tpu.memory_space<vmem>>, vector<8x32xf32>
    %cst_20 = arith.constant dense<0.000000e+00> : vector<3x32xf32>
    %43 = tpu.matmul %41, %42, %cst_20 {dimension_numbers = #tpu.dot_dimension_numbers<[1], [0], [0], [1], [0, 0, 1, 1], [], []>} : vector<3x8xf32>, vector<8x32xf32>, vector<3x32xf32> -> vector<3x32xf32>
    %c0_21 = arith.constant 0 : index
    %c0_22 = arith.constant 0 : index
    %44 = vector.load %arg7[%c0_21, %c0_22] : memref<1x32xf32, #tpu.memory_space<vmem>>, vector<1x32xf32>
    %45 = vector.broadcast %44 : vector<1x32xf32> to vector<3x32xf32>
    %46 = arith.addf %43, %45 : vector<3x32xf32>
    %cst_23 = arith.constant dense<0xFF800000> : vector<32xf32>
    %47 = vector.multi_reduction <maximumf>, %46, %cst_23 [0] : vector<3x32xf32> to vector<32xf32>
    %48 = vector.shape_cast %47 : vector<32xf32> to vector<1x32xf32>
    %49 = vector.broadcast %48 : vector<1x32xf32> to vector<3x32xf32>
    %50 = arith.subf %46, %49 : vector<3x32xf32>
    %51 = math.exp %50 : vector<3x32xf32>
    %cst_24 = arith.constant dense<0.000000e+00> : vector<32xf32>
    %52 = vector.multi_reduction <add>, %51, %cst_24 [0] : vector<3x32xf32> to vector<32xf32>
    %53 = vector.shape_cast %52 : vector<32xf32> to vector<1x32xf32>
    %54 = vector.broadcast %53 : vector<1x32xf32> to vector<3x32xf32>
    %55 = arith.divf %51, %54 : vector<3x32xf32>
    %56 = vector.extract_strided_slice %55 {offsets = [0, 0], sizes = [1, 32], strides = [1, 1]} : vector<3x32xf32> to vector<1x32xf32>
    %57 = vector.broadcast %56 : vector<1x32xf32> to vector<16x32xf32>
    %58 = arith.mulf %18, %57 : vector<16x32xf32>
    %59 = vector.extract_strided_slice %55 {offsets = [1, 0], sizes = [1, 32], strides = [1, 1]} : vector<3x32xf32> to vector<1x32xf32>
    %60 = vector.broadcast %59 : vector<1x32xf32> to vector<16x32xf32>
    %61 = arith.mulf %22, %60 : vector<16x32xf32>
    %62 = arith.addf %58, %61 : vector<16x32xf32>
    %63 = vector.extract_strided_slice %55 {offsets = [2, 0], sizes = [1, 32], strides = [1, 1]} : vector<3x32xf32> to vector<1x32xf32>
    %64 = vector.broadcast %63 : vector<1x32xf32> to vector<16x32xf32>
    %65 = arith.mulf %25, %64 : vector<16x32xf32>
    %66 = arith.addf %62, %65 : vector<16x32xf32>
    %cst_25 = arith.constant 0.000000e+00 : f32
    %67 = vector.broadcast %cst_25 : f32 to vector<16x32xf32>
    %68 = arith.maximumf %66, %67 : vector<16x32xf32>
    %c0_26 = arith.constant 0 : index
    %c0_27 = arith.constant 0 : index
    %69 = vector.load %arg9[%c0_26, %c0_27] : memref<1x96xf32, #tpu.memory_space<vmem>>, vector<1x96xf32>
    %c0_28 = arith.constant 0 : index
    %c0_29 = arith.constant 0 : index
    %70 = vector.load %arg8[%c0_28, %c0_29] : memref<32x96xf32, #tpu.memory_space<vmem>>, vector<32x96xf32>
    %cst_30 = arith.constant dense<0.000000e+00> : vector<16x96xf32>
    %71 = tpu.matmul %68, %70, %cst_30 {dimension_numbers = #tpu.dot_dimension_numbers<[1], [0], [0], [1], [0, 0, 1, 1], [], []>} : vector<16x32xf32>, vector<32x96xf32>, vector<16x96xf32> -> vector<16x96xf32>
    %72 = math.tanh %71 : vector<16x96xf32>
    %73 = arith.truncf %72 : vector<16x96xf32> to vector<16x96xbf16>
    %cst_31 = arith.constant dense<0.000000e+00> : vector<16x96xf32>
    %74 = tpu.matmul %1, %73, %cst_31 {dimension_numbers = #tpu.dot_dimension_numbers<[1], [0], [0], [1], [0, 0, 1, 1], [], []>} : vector<16x16xbf16>, vector<16x96xbf16>, vector<16x96xf32> -> vector<16x96xf32>
    %75 = vector.extract_strided_slice %74 {offsets = [0, 0], sizes = [16, 64], strides = [1, 1]} : vector<16x96xf32> to vector<16x64xf32>
    %76 = arith.truncf %75 : vector<16x64xf32> to vector<16x64xbf16>
    %cst_32 = arith.constant dense<0.000000e+00> : vector<16x64xf32>
    %77 = tpu.matmul %1, %76, %cst_32 {dimension_numbers = #tpu.dot_dimension_numbers<[1], [0], [0], [1], [0, 0, 1, 1], [], []>} : vector<16x16xbf16>, vector<16x64xbf16>, vector<16x64xf32> -> vector<16x64xf32>
    %78 = vector.extract_strided_slice %77 {offsets = [0, 0], sizes = [16, 32], strides = [1, 1]} : vector<16x64xf32> to vector<16x32xf32>
    %79 = arith.truncf %78 : vector<16x32xf32> to vector<16x32xbf16>
    %cst_33 = arith.constant dense<0.000000e+00> : vector<16x32xf32>
    %80 = tpu.matmul %1, %79, %cst_33 {dimension_numbers = #tpu.dot_dimension_numbers<[1], [0], [0], [1], [0, 0, 1, 1], [], []>} : vector<16x16xbf16>, vector<16x32xbf16>, vector<16x32xf32> -> vector<16x32xf32>
    %81 = vector.extract_strided_slice %74 {offsets = [0, 64], sizes = [16, 32], strides = [1, 1]} : vector<16x96xf32> to vector<16x32xf32>
    %82 = vector.extract_strided_slice %69 {offsets = [0, 0], sizes = [1, 32], strides = [1, 1]} : vector<1x96xf32> to vector<1x32xf32>
    %83 = vector.broadcast %82 : vector<1x32xf32> to vector<16x32xf32>
    %84 = arith.addf %81, %83 : vector<16x32xf32>
    %85 = vector.extract_strided_slice %77 {offsets = [0, 32], sizes = [16, 32], strides = [1, 1]} : vector<16x64xf32> to vector<16x32xf32>
    %86 = vector.extract_strided_slice %69 {offsets = [0, 32], sizes = [1, 32], strides = [1, 1]} : vector<1x96xf32> to vector<1x32xf32>
    %87 = vector.broadcast %86 : vector<1x32xf32> to vector<16x32xf32>
    %88 = arith.addf %85, %87 : vector<16x32xf32>
    %89 = vector.extract_strided_slice %69 {offsets = [0, 64], sizes = [1, 32], strides = [1, 1]} : vector<1x96xf32> to vector<1x32xf32>
    %90 = vector.broadcast %89 : vector<1x32xf32> to vector<16x32xf32>
    %91 = arith.addf %80, %90 : vector<16x32xf32>
    %92 = tpu.concatenate %84, %88, %91 in 1 : vector<16x32xf32>, vector<16x32xf32>, vector<16x32xf32> -> vector<16x96xf32>
    %cst_34 = arith.constant dense<0.000000e+00> : vector<96xf32>
    %93 = vector.multi_reduction <add>, %92, %cst_34 [0] : vector<16x96xf32> to vector<96xf32>
    %94 = vector.shape_cast %93 : vector<96xf32> to vector<1x96xf32>
    %cst_35 = arith.constant 6.250000e-02 : f32
    %95 = vector.broadcast %cst_35 : f32 to vector<1x96xf32>
    %96 = arith.mulf %94, %95 : vector<1x96xf32>
    %97 = vector.extract_strided_slice %96 {offsets = [0, 0], sizes = [1, 32], strides = [1, 1]} : vector<1x96xf32> to vector<1x32xf32>
    %98 = vector.extract_strided_slice %96 {offsets = [0, 32], sizes = [1, 32], strides = [1, 1]} : vector<1x96xf32> to vector<1x32xf32>
    %99 = vector.extract_strided_slice %96 {offsets = [0, 64], sizes = [1, 32], strides = [1, 1]} : vector<1x96xf32> to vector<1x32xf32>
    %100 = tpu.concatenate %97, %98, %99 in 0 : vector<1x32xf32>, vector<1x32xf32>, vector<1x32xf32> -> vector<3x32xf32>
    %c0_36 = arith.constant 0 : index
    %c0_37 = arith.constant 0 : index
    %101 = vector.load %arg10[%c0_36, %c0_37] : memref<32x8xf32, #tpu.memory_space<vmem>>, vector<32x8xf32>
    %cst_38 = arith.constant dense<0.000000e+00> : vector<3x8xf32>
    %102 = tpu.matmul %100, %101, %cst_38 {dimension_numbers = #tpu.dot_dimension_numbers<[1], [0], [0], [1], [0, 0, 1, 1], [], []>} : vector<3x32xf32>, vector<32x8xf32>, vector<3x8xf32> -> vector<3x8xf32>
    %c0_39 = arith.constant 0 : index
    %c0_40 = arith.constant 0 : index
    %103 = vector.load %arg11[%c0_39, %c0_40] : memref<1x8xf32, #tpu.memory_space<vmem>>, vector<1x8xf32>
    %104 = vector.broadcast %103 : vector<1x8xf32> to vector<3x8xf32>
    %105 = arith.addf %102, %104 : vector<3x8xf32>
    %cst_41 = arith.constant 0.000000e+00 : f32
    %106 = vector.broadcast %cst_41 : f32 to vector<3x8xf32>
    %107 = arith.maximumf %105, %106 : vector<3x8xf32>
    %c0_42 = arith.constant 0 : index
    %c0_43 = arith.constant 0 : index
    %108 = vector.load %arg12[%c0_42, %c0_43] : memref<8x32xf32, #tpu.memory_space<vmem>>, vector<8x32xf32>
    %cst_44 = arith.constant dense<0.000000e+00> : vector<3x32xf32>
    %109 = tpu.matmul %107, %108, %cst_44 {dimension_numbers = #tpu.dot_dimension_numbers<[1], [0], [0], [1], [0, 0, 1, 1], [], []>} : vector<3x8xf32>, vector<8x32xf32>, vector<3x32xf32> -> vector<3x32xf32>
    %c0_45 = arith.constant 0 : index
    %c0_46 = arith.constant 0 : index
    %110 = vector.load %arg13[%c0_45, %c0_46] : memref<1x32xf32, #tpu.memory_space<vmem>>, vector<1x32xf32>
    %111 = vector.broadcast %110 : vector<1x32xf32> to vector<3x32xf32>
    %112 = arith.addf %109, %111 : vector<3x32xf32>
    %cst_47 = arith.constant dense<0xFF800000> : vector<32xf32>
    %113 = vector.multi_reduction <maximumf>, %112, %cst_47 [0] : vector<3x32xf32> to vector<32xf32>
    %114 = vector.shape_cast %113 : vector<32xf32> to vector<1x32xf32>
    %115 = vector.broadcast %114 : vector<1x32xf32> to vector<3x32xf32>
    %116 = arith.subf %112, %115 : vector<3x32xf32>
    %117 = math.exp %116 : vector<3x32xf32>
    %cst_48 = arith.constant dense<0.000000e+00> : vector<32xf32>
    %118 = vector.multi_reduction <add>, %117, %cst_48 [0] : vector<3x32xf32> to vector<32xf32>
    %119 = vector.shape_cast %118 : vector<32xf32> to vector<1x32xf32>
    %120 = vector.broadcast %119 : vector<1x32xf32> to vector<3x32xf32>
    %121 = arith.divf %117, %120 : vector<3x32xf32>
    %122 = vector.extract_strided_slice %121 {offsets = [0, 0], sizes = [1, 32], strides = [1, 1]} : vector<3x32xf32> to vector<1x32xf32>
    %123 = vector.broadcast %122 : vector<1x32xf32> to vector<16x32xf32>
    %124 = arith.mulf %84, %123 : vector<16x32xf32>
    %125 = vector.extract_strided_slice %121 {offsets = [1, 0], sizes = [1, 32], strides = [1, 1]} : vector<3x32xf32> to vector<1x32xf32>
    %126 = vector.broadcast %125 : vector<1x32xf32> to vector<16x32xf32>
    %127 = arith.mulf %88, %126 : vector<16x32xf32>
    %128 = arith.addf %124, %127 : vector<16x32xf32>
    %129 = vector.extract_strided_slice %121 {offsets = [2, 0], sizes = [1, 32], strides = [1, 1]} : vector<3x32xf32> to vector<1x32xf32>
    %130 = vector.broadcast %129 : vector<1x32xf32> to vector<16x32xf32>
    %131 = arith.mulf %91, %130 : vector<16x32xf32>
    %132 = arith.addf %128, %131 : vector<16x32xf32>
    %cst_49 = arith.constant 0.000000e+00 : f32
    %133 = vector.broadcast %cst_49 : f32 to vector<16x32xf32>
    %134 = arith.maximumf %132, %133 : vector<16x32xf32>
    %c0_50 = arith.constant 0 : index
    %c0_51 = arith.constant 0 : index
    %135 = vector.load %arg15[%c0_50, %c0_51] : memref<1x96xf32, #tpu.memory_space<vmem>>, vector<1x96xf32>
    %c0_52 = arith.constant 0 : index
    %c0_53 = arith.constant 0 : index
    %136 = vector.load %arg14[%c0_52, %c0_53] : memref<32x96xf32, #tpu.memory_space<vmem>>, vector<32x96xf32>
    %cst_54 = arith.constant dense<0.000000e+00> : vector<16x96xf32>
    %137 = tpu.matmul %134, %136, %cst_54 {dimension_numbers = #tpu.dot_dimension_numbers<[1], [0], [0], [1], [0, 0, 1, 1], [], []>} : vector<16x32xf32>, vector<32x96xf32>, vector<16x96xf32> -> vector<16x96xf32>
    %138 = math.tanh %137 : vector<16x96xf32>
    %139 = arith.truncf %138 : vector<16x96xf32> to vector<16x96xbf16>
    %cst_55 = arith.constant dense<0.000000e+00> : vector<16x96xf32>
    %140 = tpu.matmul %1, %139, %cst_55 {dimension_numbers = #tpu.dot_dimension_numbers<[1], [0], [0], [1], [0, 0, 1, 1], [], []>} : vector<16x16xbf16>, vector<16x96xbf16>, vector<16x96xf32> -> vector<16x96xf32>
    %141 = vector.extract_strided_slice %140 {offsets = [0, 0], sizes = [16, 64], strides = [1, 1]} : vector<16x96xf32> to vector<16x64xf32>
    %142 = arith.truncf %141 : vector<16x64xf32> to vector<16x64xbf16>
    %cst_56 = arith.constant dense<0.000000e+00> : vector<16x64xf32>
    %143 = tpu.matmul %1, %142, %cst_56 {dimension_numbers = #tpu.dot_dimension_numbers<[1], [0], [0], [1], [0, 0, 1, 1], [], []>} : vector<16x16xbf16>, vector<16x64xbf16>, vector<16x64xf32> -> vector<16x64xf32>
    %144 = vector.extract_strided_slice %143 {offsets = [0, 0], sizes = [16, 32], strides = [1, 1]} : vector<16x64xf32> to vector<16x32xf32>
    %145 = arith.truncf %144 : vector<16x32xf32> to vector<16x32xbf16>
    %cst_57 = arith.constant dense<0.000000e+00> : vector<16x32xf32>
    %146 = tpu.matmul %1, %145, %cst_57 {dimension_numbers = #tpu.dot_dimension_numbers<[1], [0], [0], [1], [0, 0, 1, 1], [], []>} : vector<16x16xbf16>, vector<16x32xbf16>, vector<16x32xf32> -> vector<16x32xf32>
    %147 = vector.extract_strided_slice %140 {offsets = [0, 64], sizes = [16, 32], strides = [1, 1]} : vector<16x96xf32> to vector<16x32xf32>
    %148 = vector.extract_strided_slice %135 {offsets = [0, 0], sizes = [1, 32], strides = [1, 1]} : vector<1x96xf32> to vector<1x32xf32>
    %149 = vector.broadcast %148 : vector<1x32xf32> to vector<16x32xf32>
    %150 = arith.addf %147, %149 : vector<16x32xf32>
    %151 = vector.extract_strided_slice %143 {offsets = [0, 32], sizes = [16, 32], strides = [1, 1]} : vector<16x64xf32> to vector<16x32xf32>
    %152 = vector.extract_strided_slice %135 {offsets = [0, 32], sizes = [1, 32], strides = [1, 1]} : vector<1x96xf32> to vector<1x32xf32>
    %153 = vector.broadcast %152 : vector<1x32xf32> to vector<16x32xf32>
    %154 = arith.addf %151, %153 : vector<16x32xf32>
    %155 = vector.extract_strided_slice %135 {offsets = [0, 64], sizes = [1, 32], strides = [1, 1]} : vector<1x96xf32> to vector<1x32xf32>
    %156 = vector.broadcast %155 : vector<1x32xf32> to vector<16x32xf32>
    %157 = arith.addf %146, %156 : vector<16x32xf32>
    %158 = tpu.concatenate %150, %154, %157 in 1 : vector<16x32xf32>, vector<16x32xf32>, vector<16x32xf32> -> vector<16x96xf32>
    %cst_58 = arith.constant dense<0.000000e+00> : vector<96xf32>
    %159 = vector.multi_reduction <add>, %158, %cst_58 [0] : vector<16x96xf32> to vector<96xf32>
    %160 = vector.shape_cast %159 : vector<96xf32> to vector<1x96xf32>
    %cst_59 = arith.constant 6.250000e-02 : f32
    %161 = vector.broadcast %cst_59 : f32 to vector<1x96xf32>
    %162 = arith.mulf %160, %161 : vector<1x96xf32>
    %163 = vector.extract_strided_slice %162 {offsets = [0, 0], sizes = [1, 32], strides = [1, 1]} : vector<1x96xf32> to vector<1x32xf32>
    %164 = vector.extract_strided_slice %162 {offsets = [0, 32], sizes = [1, 32], strides = [1, 1]} : vector<1x96xf32> to vector<1x32xf32>
    %165 = vector.extract_strided_slice %162 {offsets = [0, 64], sizes = [1, 32], strides = [1, 1]} : vector<1x96xf32> to vector<1x32xf32>
    %166 = tpu.concatenate %163, %164, %165 in 0 : vector<1x32xf32>, vector<1x32xf32>, vector<1x32xf32> -> vector<3x32xf32>
    %c0_60 = arith.constant 0 : index
    %c0_61 = arith.constant 0 : index
    %167 = vector.load %arg16[%c0_60, %c0_61] : memref<32x8xf32, #tpu.memory_space<vmem>>, vector<32x8xf32>
    %cst_62 = arith.constant dense<0.000000e+00> : vector<3x8xf32>
    %168 = tpu.matmul %166, %167, %cst_62 {dimension_numbers = #tpu.dot_dimension_numbers<[1], [0], [0], [1], [0, 0, 1, 1], [], []>} : vector<3x32xf32>, vector<32x8xf32>, vector<3x8xf32> -> vector<3x8xf32>
    %c0_63 = arith.constant 0 : index
    %c0_64 = arith.constant 0 : index
    %169 = vector.load %arg17[%c0_63, %c0_64] : memref<1x8xf32, #tpu.memory_space<vmem>>, vector<1x8xf32>
    %170 = vector.broadcast %169 : vector<1x8xf32> to vector<3x8xf32>
    %171 = arith.addf %168, %170 : vector<3x8xf32>
    %cst_65 = arith.constant 0.000000e+00 : f32
    %172 = vector.broadcast %cst_65 : f32 to vector<3x8xf32>
    %173 = arith.maximumf %171, %172 : vector<3x8xf32>
    %c0_66 = arith.constant 0 : index
    %c0_67 = arith.constant 0 : index
    %174 = vector.load %arg18[%c0_66, %c0_67] : memref<8x32xf32, #tpu.memory_space<vmem>>, vector<8x32xf32>
    %cst_68 = arith.constant dense<0.000000e+00> : vector<3x32xf32>
    %175 = tpu.matmul %173, %174, %cst_68 {dimension_numbers = #tpu.dot_dimension_numbers<[1], [0], [0], [1], [0, 0, 1, 1], [], []>} : vector<3x8xf32>, vector<8x32xf32>, vector<3x32xf32> -> vector<3x32xf32>
    %c0_69 = arith.constant 0 : index
    %c0_70 = arith.constant 0 : index
    %176 = vector.load %arg19[%c0_69, %c0_70] : memref<1x32xf32, #tpu.memory_space<vmem>>, vector<1x32xf32>
    %177 = vector.broadcast %176 : vector<1x32xf32> to vector<3x32xf32>
    %178 = arith.addf %175, %177 : vector<3x32xf32>
    %cst_71 = arith.constant dense<0xFF800000> : vector<32xf32>
    %179 = vector.multi_reduction <maximumf>, %178, %cst_71 [0] : vector<3x32xf32> to vector<32xf32>
    %180 = vector.shape_cast %179 : vector<32xf32> to vector<1x32xf32>
    %181 = vector.broadcast %180 : vector<1x32xf32> to vector<3x32xf32>
    %182 = arith.subf %178, %181 : vector<3x32xf32>
    %183 = math.exp %182 : vector<3x32xf32>
    %cst_72 = arith.constant dense<0.000000e+00> : vector<32xf32>
    %184 = vector.multi_reduction <add>, %183, %cst_72 [0] : vector<3x32xf32> to vector<32xf32>
    %185 = vector.shape_cast %184 : vector<32xf32> to vector<1x32xf32>
    %186 = vector.broadcast %185 : vector<1x32xf32> to vector<3x32xf32>
    %187 = arith.divf %183, %186 : vector<3x32xf32>
    %188 = vector.extract_strided_slice %187 {offsets = [0, 0], sizes = [1, 32], strides = [1, 1]} : vector<3x32xf32> to vector<1x32xf32>
    %189 = vector.broadcast %188 : vector<1x32xf32> to vector<16x32xf32>
    %190 = arith.mulf %150, %189 : vector<16x32xf32>
    %191 = vector.extract_strided_slice %187 {offsets = [1, 0], sizes = [1, 32], strides = [1, 1]} : vector<3x32xf32> to vector<1x32xf32>
    %192 = vector.broadcast %191 : vector<1x32xf32> to vector<16x32xf32>
    %193 = arith.mulf %154, %192 : vector<16x32xf32>
    %194 = arith.addf %190, %193 : vector<16x32xf32>
    %195 = vector.extract_strided_slice %187 {offsets = [2, 0], sizes = [1, 32], strides = [1, 1]} : vector<3x32xf32> to vector<1x32xf32>
    %196 = vector.broadcast %195 : vector<1x32xf32> to vector<16x32xf32>
    %197 = arith.mulf %157, %196 : vector<16x32xf32>
    %198 = arith.addf %194, %197 : vector<16x32xf32>
    %cst_73 = arith.constant 0.000000e+00 : f32
    %199 = vector.broadcast %cst_73 : f32 to vector<16x32xf32>
    %200 = arith.maximumf %198, %199 : vector<16x32xf32>
    %cst_74 = arith.constant 0.000000e+00 : f32
    %201 = vector.broadcast %cst_74 : f32 to vector<16x32xf32>
    %202 = tpu.concatenate %68, %134, %200, %201 in 1 : vector<16x32xf32>, vector<16x32xf32>, vector<16x32xf32>, vector<16x32xf32> -> vector<16x128xf32>
    %c0_75 = arith.constant 0 : index
    %c0_76 = arith.constant 0 : index
    %203 = vector.load %arg20[%c0_75, %c0_76] : memref<16x128xf32, #tpu.memory_space<vmem>>, vector<16x128xf32>
    tpu.vector_store %arg20[%c0_75, %c0_76], %202 {strides = array<i32>} : memref<16x128xf32, #tpu.memory_space<vmem>>, vector<16x128xf32>,
    return
  }
}

</mosaic_0001>

<bundles_post_ra>
// kernel: tpu_custom_call.1
= control target key start
LH: loop header
LB: loop body
LE: loop exit
PB: predicated region body
PF: predicated region fallthrough
CT: control target
= control target key end

     0   :  { %s1856_s0 = inlined_call_operand.hbm [shape: f32[16,16], index: 0, kind: input, shape index: {}]   ;;  %s1857_s1 = inlined_call_operand.hbm [shape: f32[16,32], index: 1, kind: input, shape index: {}]   ;;  %s1858_s2 = inlined_call_operand.vmem [shape: f32[32,96], index: 2, kind: input, shape index: {}]   ;;  %s1859_s3 = inlined_call_operand.vmem [shape: f32[1,96], index: 3, kind: input, shape index: {}]   ;;  %s1860_s4 = inlined_call_operand.vmem [shape: f32[32,8], index: 4, kind: input, shape index: {}]   ;;  %s1861_s5 = inlined_call_operand.hbm [shape: f32[1,8], index: 5, kind: input, shape index: {}]   ;;  %s1862_s6 = inlined_call_operand.vmem [shape: f32[8,32], index: 6, kind: input, shape index: {}]   ;;  %s1863_s7 = inlined_call_operand.hbm [shape: f32[1,32], index: 7, kind: input, shape index: {}]   ;;  %s1864_s8 = inlined_call_operand.vmem [shape: f32[32,96], index: 8, kind: input, shape index: {}]   ;;  %s1865_s9 = inlined_call_operand.hbm [shape: f32[1,96], index: 9, kind: input, shape index: {}]   ;;  %s1866_s10 = inlined_call_operand.vmem [shape: f32[32,8], index: 10, kind: input, shape index: {}]   ;;  %s1867_s11 = inlined_call_operand.hbm [shape: f32[1,8], index: 11, kind: input, shape index: {}]   ;;  %s1868_s12 = inlined_call_operand.vmem [shape: f32[8,32], index: 12, kind: input, shape index: {}]   ;;  %s1869_s13 = inlined_call_operand.hbm [shape: f32[1,32], index: 13, kind: input, shape index: {}]   ;;  %s1870_s14 = inlined_call_operand.vmem [shape: f32[32,96], index: 14, kind: input, shape index: {}]   ;;  %s1871_s15 = inlined_call_operand.hbm [shape: f32[1,96], index: 15, kind: input, shape index: {}]   ;;  %s1872_s16 = inlined_call_operand.vmem [shape: f32[32,8], index: 16, kind: input, shape index: {}]   ;;  %s1873_s17 = inlined_call_operand.hbm [shape: f32[1,8], index: 17, kind: input, shape index: {}]   ;;  %s1874_s18 = inlined_call_operand.vmem [shape: f32[8,32], index: 18, kind: input, shape index: {}]   ;;  %s1875_s19 = inlined_call_operand.hbm [shape: f32[1,32], index: 19, kind: input, shape index: {}]   ;;  %s1876_s20 = inlined_call_operand.hbm [shape: f32[16,128], index: 20, kind: output, shape index: {}]  }
   0x1   :  { %1883 = sst [smem:[#allocation27_spill]] %s1856_s0 }
   0x2   :  { %1884 = sst [smem:[#allocation28_spill]] %s1857_s1 }
   0x3   :  { %1885 = sst [smem:[#allocation29_spill]] %s1858_s2 }
   0x4   :  { %1886 = sst [smem:[#allocation30_spill]] %s1859_s3 }
   0x5   :  { %1887 = sst [smem:[#allocation31_spill]] %s1860_s4 }
   0x6   :  { %25 = vsyncpa [#allocation3], 0 }
   0x7   :  { %26 = vsyncpa [#allocation6], 0 }
   0x8   :  { %27 = vsyncpa [#allocation9], 0 }
   0x9   :  { %28 = vsyncpa [#allocation12], 0 }
   0xa   :  { %29 = vsyncpa [#allocation15], 0 }
   0xb   :  { %30 = vsyncpa [#allocation18], 0 }
   0xc   :  { %31 = vsyncpa [#allocation4], 0  ;;  %s1888_s23 = sld [smem:[#allocation28_spill]]  ;;  %s1402_s2 = smov [#allocation5]  }
   0xd   :  { %s51_s25 = sshll.u32 %s1402_s2, 4  ;;  %s82_s27 = sshll.u32 %s1863_s7, 4  ;;  %s52_s25 = int_to_ptr.vmem [resolvable:$true] %s51_s25  ;;  %s83_s27 = int_to_ptr.hbm [resolvable:$true] %s82_s27 }
   0xe   :  { %s1879_s28 = smov 128   ;;  %s1881_s4 = smov 8  }
   0xf   :  { %s1405_s29 = smov [#allocation8]   ;;  %s108_s1 = sshll.u32 %s1867_s11, 4  ;;  %s109_s1 = int_to_ptr.hbm [resolvable:$true] %s108_s1 }
  0x10   :  { %s84_s30 = sshll.u32 %s1405_s29, 4  ;;  %s134_s7 = sshll.u32 %s1871_s15, 4  ;;  %s85_s30 = int_to_ptr.vmem [resolvable:$true] %s84_s30  ;;  %s135_s7 = int_to_ptr.hbm [resolvable:$true] %s134_s7 }
  0x11   :  { %87 = dma.hbm_to_vmem [thread:$0]  %s83_s27, 16, %s85_s30, [#allocation9]  }
  0x12   :  { %s49_s24 = sshll.u32 %s1888_s23, 4  ;;  %s1406_s2 = smov [#allocation11]   ;;  %s50_s24 = int_to_ptr.hbm [resolvable:$true] %s49_s24 }
  0x13   :  { %57 = dma.hbm_to_vmem [thread:$0]  %s50_s24, 256, %s52_s25, [#allocation6], %s1879_s28, %s1879_s28, %s1881_s4  }
  0x14   :  { %s110_s3 = sshll.u32 %s1406_s2, 4  ;;  %s1407_s24 = smov [#allocation14]   ;;  %s111_s3 = int_to_ptr.vmem [resolvable:$true] %s110_s3 }
  0x15   :  { %113 = dma.hbm_to_vmem [thread:$0]  %s109_s1, 16, %s111_s3, [#allocation12]  }
  0x16   :  { %s136_s25 = sshll.u32 %s1407_s24, 4  ;;  %s1889_s28 = sld [smem:[#allocation27_spill]]  ;;  %s137_s25 = int_to_ptr.vmem [resolvable:$true] %s136_s25 }
  0x17   :  { %139 = dma.hbm_to_vmem [thread:$0]  %s135_s7, 16, %s137_s25, [#allocation15]  }
  0x18   :  { %s69_s30 = sshll.u32 %s1861_s5, 4  ;;  %s1408_s0 = smov [#allocation2]   ;;  %s70_s30 = int_to_ptr.hbm [resolvable:$true] %s69_s30 }
  0x19   :  { %s38_s15 = sshll.u32 %s1408_s0, 4  ;;  %s1890_s21 = smov 8   ;;  %s39_s15 = int_to_ptr.vmem [resolvable:$true] %s38_s15 }
  0x1a   :  { %s1891_s22 = smov 128   ;;  %s1409_s1 = smov [#allocation7]  }
  0x1b   :  { %s71_s23 = sshll.u32 %s1409_s1, 4  ;;  %s121_s5 = sshll.u32 %s1869_s13, 4  ;;  %s72_s23 = int_to_ptr.vmem [resolvable:$true] %s71_s23  ;;  %s122_s5 = int_to_ptr.hbm [resolvable:$true] %s121_s5 }
  0x1c   :  { %s36_s4 = sshll.u32 %s1889_s28, 4  ;;  %s95_s28 = sshll.u32 %s1865_s9, 4  ;;  %s37_s4 = int_to_ptr.hbm [resolvable:$true] %s36_s4  ;;  %s96_s28 = int_to_ptr.hbm [resolvable:$true] %s95_s28 }
  0x1d   :  { %44 = dma.hbm_to_vmem [thread:$0]  %s37_s4, 256, %s39_s15, [#allocation3], %s1891_s22, %s1891_s22, %s1890_s21  }
  0x1e   :  { %74 = dma.hbm_to_vmem [thread:$0]  %s70_s30, 16, %s72_s23, [#allocation6]  }
  0x1f   :  { %s1410_s25 = smov [#allocation10]   ;;  %s1411_s29 = smov [#allocation13]  }
  0x20   :  { %s97_s26 = sshll.u32 %s1410_s25, 4  ;;  %s123_s4 = sshll.u32 %s1411_s29, 4  ;;  %s98_s26 = int_to_ptr.vmem [resolvable:$true] %s97_s26  ;;  %s124_s4 = int_to_ptr.vmem [resolvable:$true] %s123_s4 }
  0x21   :  { %100 = dma.hbm_to_vmem [thread:$0]  %s96_s28, 16, %s98_s26, [#allocation9]  }
  0x22   :  { %s147_s0 = sshll.u32 %s1873_s17, 4  ;;  %s160_s15 = sshll.u32 %s1875_s19, 4  ;;  %s148_s0 = int_to_ptr.hbm [resolvable:$true] %s147_s0  ;;  %s161_s15 = int_to_ptr.hbm [resolvable:$true] %s160_s15 }
  0x23   :  { %126 = dma.hbm_to_vmem [thread:$0]  %s122_s5, 16, %s124_s4, [#allocation12]  }
  0x24   :  { %s1412_s1 = smov [#allocation16]   ;;  %s1413_s23 = smov [#allocation17]  }
  0x25   :  { %s149_s13 = sshll.u32 %s1412_s1, 4  ;;  %s162_s2 = sshll.u32 %s1413_s23, 4  ;;  %s150_s13 = int_to_ptr.vmem [resolvable:$true] %s149_s13  ;;  %s163_s2 = int_to_ptr.vmem [resolvable:$true] %s162_s2 }
  0x26   :  { %152 = dma.hbm_to_vmem [thread:$0]  %s148_s0, 16, %s150_s13, [#allocation15]  }
  0x27   :  { %165 = dma.hbm_to_vmem [thread:$0]  %s161_s15, 16, %s163_s2, [#allocation18]  }
  0x28   :  { %1388 = dma.done.wait [#allocation3], 256  }
  0x29   :  { %1389 = vsyncadd [#allocation3], 4294967040 }
  0x2a   :  { %1390 = dma.done.wait [#allocation6], 272  }
  0x2b   :  { %1391 = vsyncadd [#allocation6], 4294967024 }
  0x2c   :  { %1392 = dma.done.wait [#allocation9], 32  }
  0x2d   :  { %1393 = vsyncadd [#allocation9], 4294967264 }
  0x2e   :  { %1394 = dma.done.wait [#allocation12], 32  }
  0x2f   :  { %1395 = vsyncadd [#allocation12], 4294967264 }
  0x30   :  { %1396 = dma.done.wait [#allocation15], 32  }
  0x31   :  { %1397 = vsyncadd [#allocation15], 4294967264 }
  0x32   :  { %1398 = dma.done.wait [#allocation18], 16  }
  0x33   :  { %1399 = vsyncadd [#allocation18], 4294967280  ;;  %s1892_s3 = sld [smem:[#allocation29_spill]]  ;;  %v210_v4 = vld [vmem:[#allocation5] sm:$0xff]  ;;  %vm217_vm0 = vcmask 261120   ;;  %v211_v5 = vld [vmem:[#allocation5 + $0x8] sm:$0xff] }
  0x34   :  { %s1893_s11 = sld [smem:[#allocation30_spill]]  ;;  %s1414_s27 = smov 64   ;;  %v207_v10 = vld [vmem:[#allocation2] sm:$0xff]  ;;  %v208_v11 = vld [vmem:[#allocation2 + $0x8] sm:$0xff]  ;;  %vm250_vm1 = vcmask 130048   ;;  %vm326_vm2 = vcmask 523264  }
  0x35   :  { %v1577_v14 = vpack.c.bf16 %v208_v11, %v207_v10  ;;  %vm329_vm3 = vcmask 785408   ;;  %s1415_s0 = smov 96   ;;  %s1894_s15 = sld [smem:[#allocation31_spill]]  ;;  %vm347_vm4 = vcmask 1040384   ;;  %vm349_vm5 = vcmask 1041408   ;;  %v383_v56 = vld [vmem:[%s1862_s6] sm:$0xff] }
  0x36   :  { %v1092_v57 = vld [vmem:[#allocation7] ss:$0 sm:$0xff]  ;;  %vm388_vm6 = vcmask 64512   ;;  %v1093_v61 = vld [vmem:[#allocation8] ss:$0 sm:$0xff]  ;;  %vm412_vm7 = vcmask 256000  }
  0x37   :  { %s1416_s6 = smov 32  }
  0x39   :  { %v216_v0 = vld [vmem:[%s1892_s3 + $0x18] sm:$0xff]  ;;  %v215_v1 = vld [vmem:[%s1892_s3 + $0x10] sm:$0xff]  ;;  %v214_v2 = vld [vmem:[%s1892_s3 + $0x8] sm:$0xff] }
  0x3a   :  { %236 = vmatpush.msra.mxu0 %v216_v0  ;;  %v213_v3 = vld [vmem:[%s1892_s3] sm:$0xff] }
  0x3b   :  { %v1091_v6 = vld [vmem:[%s1893_s11] ss:$0 sm:$0xff]  ;;  %v354_v48 = vld [vmem:[%s1894_s15 + $0x18] sm:$0xff]  ;;  %v353_v49 = vld [vmem:[%s1894_s15 + $0x10] sm:$0xff] }
  0x3c   :  { %237 = vmatpush.msra.mxu0 %v215_v1  ;;  %286 = vrot.lane.b32.xlu0 %v1091_v6, %s1414_s27  ;;  %v352_v50 = vld [vmem:[%s1894_s15 + $0x8] sm:$0xff]  ;;  %v351_v51 = vld [vmem:[%s1894_s15] sm:$0xff] }
  0x3e   :  { %238 = vmatpush.msra.mxu0 %v214_v2 }
  0x40   :  { %239 = vmatpush.msra.mxu0 %v213_v3 }
  0x41   :  { %1054 = vmatmul.msk.f32.vlgmr.msra.gmra.mxu0 %vm217_vm0, %v210_v4 }
  0x49   :  { %1055 = vmatmul.msk.f32.gmra.mxu0 %vm217_vm0, %v211_v5 }
  0xae   :  { %v287_v15 = vpop.permute.xlu0 %286 }
  0xbe   :  { %v241_v7 = vpop.f32.mrf.mxu0 }
  0xbf   :  { %1100 = vtanh.f32 %v241_v7 }
  0xc5   :  { %v1101_v9 = vpop.eup %1100 }
  0xc6   :  { %v244_v8 = vpop.f32.mrf.mxu0 }
  0xc7   :  { %1102 = vtanh.f32 %v244_v8 }
  0xcd   :  { %v1103_v12 = vpop.eup %1102 }
  0xce   :  { %v249_v13 = vpack.c.bf16 %v1103_v12, %v1101_v9 }
  0xd0   :  { %261 = vmatpush.bf16.msra.mxu1 %v249_v13 }
  0xd3   :  { %1056 = vmatmul.msk.bf16.vlgmr.msra.gmra.mxu1 %vm250_vm1, %v1577_v14 }
  0xd4   :  { %374 = vmatpush.msrb.mxu1 %v354_v48 }
  0xd6   :  { %375 = vmatpush.msrb.mxu1 %v353_v49 }
  0xd8   :  { %376 = vmatpush.msrb.mxu1 %v352_v50 }
  0xda   :  { %377 = vmatpush.msrb.mxu1 %v351_v51 }
 0x150   :  { %v263_v16 = vpop.f32.mrf.mxu1 }
 0x151   :  { %v1581_v17 = vadd.f32 %v287_v15, %v263_v16 }
 0x153   :  { %310 = vrot.lane.b32.xlu0 %v1581_v17, %s1414_s27 }
 0x158   :  { %v265_v18 = vpop.f32.mrf.mxu1 }
 0x159   :  { %v1585_v19 = vadd.f32 %v287_v15, %v265_v18  ;;  %v268_v20 = vpack.c.bf16 %v265_v18, %v263_v16 }
 0x15b   :  { %312 = vrot.lane.b32.xlu1 %v1585_v19, %s1414_s27  ;;  %276 = vmatpush.bf16.msra.mxu2 %v268_v20 }
 0x15e   :  { %1057 = vmatmul.msk.bf16.vlgmr.msra.gmra.mxu2 %vm250_vm1, %v1577_v14 }
 0x15f   :  { %407 = vmatpush.msrb.mxu2 %v383_v56  ;;  %v1094_v56 = vld [vmem:[#allocation10] ss:$0 sm:$0xff] }
 0x1c5   :  { %v311_v33 = vpop.permute.xlu0 %310 }
 0x1cd   :  { %v313_v28 = vpop.permute.xlu1 %312 }
 0x1e1   :  { %v278_v21 = vpop.f32.mrf.mxu2 }
 0x1e2   :  { %v1603_v30 = vadd.f32 %v1091_v6, %v278_v21 }
 0x1e4   :  { %v324_v35 = vsel %vm217_vm0, %v311_v33, %v1603_v30 }
 0x1e9   :  { %v280_v22 = vpop.f32.mrf.mxu2 }
 0x1ea   :  { %v283_v23 = vpack.c.bf16 %v280_v22, %v278_v21  ;;  %v1601_v29 = vadd.f32 %v1091_v6, %v280_v22 }
 0x1ec   :  { %301 = vmatpush.bf16.msra.mxu3 %v283_v23  ;;  %v325_v32 = vsel %vm217_vm0, %v313_v28, %v1601_v29 }
 0x1ef   :  { %1058 = vmatmul.msk.bf16.vlgmr.msra.gmra.mxu3 %vm250_vm1, %v1577_v14 }
 0x272   :  { %v303_v24 = vpop.f32.mrf.mxu3 }
 0x273   :  { %v1593_v25 = vadd.f32 %v303_v24, %v287_v15 }
 0x275   :  { %318 = vrot.lane.b32.xlu1 %v1593_v25, %s1414_s27 }
 0x27a   :  { %v305_v26 = vpop.f32.mrf.mxu3 }
 0x27b   :  { %v1597_v27 = vadd.f32 %v305_v26, %v287_v15 }
 0x27d   :  { %320 = vrot.lane.b32.xlu2 %v1597_v27, %s1414_s27 }
 0x2d7   :  { %v321_v31 = vpop.permute.xlu2 %320 }
 0x2d8   :  { %v328_v34 = vsel %vm326_vm2, %v325_v32, %v321_v31 }
 0x2d9   :  { %v331_v38 = vsel %vm329_vm3, %v328_v34, 0.0 }
 0x2e7   :  { %v319_v36 = vpop.permute.xlu1 %318 }
 0x2e8   :  { %v327_v37 = vsel %vm326_vm2, %v324_v35, %v319_v36 }
 0x2e9   :  { %v330_v39 = vsel %vm329_vm3, %v327_v37, 0.0 }
 0x2ea   :  { %v332_v40 = vadd.f32 %v331_v38, %v330_v39 }
 0x2ec   :  { %v333_v41 = vrot.slane %v332_v40, 4 }
 0x2ee   :  { %v334_v42 = vadd.f32 %v333_v41, %v332_v40 }
 0x2f0   :  { %v335_v43 = vrot.slane %v334_v42, 2 }
 0x2f2   :  { %v336_v44 = vadd.f32 %v335_v43, %v334_v42 }
 0x2f4   :  { %v337_v45 = vrot.slane %v336_v44, 1 }
 0x2f6   :  { %v338_v46 = vadd.f32 %v337_v45, %v336_v44 }
 0x2f8   :  { %v339_v47 = vmul.f32 0.0625, %v338_v46 }
 0x2fa   :  { %344 = vrot.lane.b32.xlu0 %v339_v47, %s1414_s27  ;;  %341 = vrot.lane.b32.xlu2 %v339_v47, %s1415_s0 }
 0x354   :  { %v342_v52 = vpop.permute.xlu2 %341 }
 0x355   :  { %v348_v53 = vsel %vm347_vm4, %v339_v47, %v342_v52 }
 0x36c   :  { %v345_v54 = vpop.permute.xlu0 %344 }
 0x36d   :  { %v350_v55 = vsel %vm349_vm5, %v348_v53, %v345_v54  ;;  %v485_v53 = vld [vmem:[%s1864_s8] sm:$0xff] }
 0x36e   :  { %1059 = vmatmul.msk.f32.vlgmr.msrb.gmra.mxu1 %vm217_vm0, %v350_v55 }
 0x3eb   :  { %v379_v58 = vpop.f32.mrf.mxu1 }
 0x3ec   :  { %v380_v59 = vadd.f32 %v1092_v57, %v379_v58 }
 0x3ee   :  { %v382_v60 = vmax.f32 %v380_v59, 0.0 }
 0x3f0   :  { %1060 = vmatmul.msk.f32.vlgmr.msrb.gmra.mxu2 %vm388_vm6, %v382_v60 }
 0x473   :  { %v409_v62 = vpop.f32.mrf.mxu2 }
 0x474   :  { %v410_v63 = vadd.f32 %v1093_v61, %v409_v62 }
 0x476   :  { %v413_v0 = vsel %vm412_vm7, %v410_v63, -inf }
 0x477   :  { %v414_v1 = vrot.slane %v413_v0, 4 }
 0x479   :  { %v415_v2 = vmax.f32 %v413_v0, %v414_v1 }
 0x47b   :  { %v416_v3 = vrot.slane %v415_v2, 2 }
 0x47d   :  { %v417_v4 = vmax.f32 %v415_v2, %v416_v3 }
 0x47f   :  { %v418_v5 = vrot.slane %v417_v4, 1 }
 0x481   :  { %v419_v6 = vmax.f32 %v417_v4, %v418_v5 }
 0x483   :  { %v420_v7 = vsub.f32 %v410_v63, %v419_v6 }
 0x485   :  { %v421_v8 = vmul.f32 1.442695, %v420_v7 }
 0x487   :  { %1104 = vpow2.f32 %v421_v8 }
 0x48d   :  { %v1105_v9 = vpop.eup %1104 }
 0x48e   :  { %v423_v10 = vsel %vm412_vm7, %v1105_v9, 0.0 }
 0x48f   :  { %v424_v11 = vrot.slane %v423_v10, 4 }
 0x491   :  { %v425_v12 = vadd.f32 %v424_v11, %v423_v10 }
 0x493   :  { %v426_v13 = vrot.slane %v425_v12, 2 }
 0x495   :  { %v427_v15 = vadd.f32 %v426_v13, %v425_v12 }
 0x497   :  { %v428_v16 = vrot.slane %v427_v15, 1 }
 0x499   :  { %v429_v18 = vadd.f32 %v428_v16, %v427_v15 }
 0x49b   :  { %1106 = vrcp.f32 %v429_v18  ;;  %v441_v23 = vand.u32 2147483648, %v429_v18  ;;  %v439_v26 = vand.u32 2147483647, %v429_v18  ;;  %vm435_vm9 = vweird.f32 %v429_v18 }
 0x49d   :  { %v442_v31 = vor.u32 1.1754944e-38, %v441_v23  ;;  %vm440_vm11 = vcmp.eq.f32.partialorder %v439_v26, 8.507059e+37 }
 0x4a1   :  { %v1107_v20 = vpop.eup %1106 }
 0x4a2   :  { %v431_v21 = vmul.f32 %v1107_v20, %v429_v18  ;;  %vm436_vm8 = vweird.f32 %v1107_v20 }
 0x4a3   :  { %vm437_vm10 = vmor %vm435_vm9, %vm436_vm8 }
 0x4a4   :  { %v432_v22 = vsub.f32 1.0, %v431_v21 }
 0x4a6   :  { %v433_v24 = vmul.f32 %v1107_v20, %v432_v22 }
 0x4a8   :  { %v434_v28 = vadd.f32 %v1107_v20, %v433_v24 }
 0x4aa   :  { %v438_v32 = vsel %vm437_vm10, %v1107_v20, %v434_v28 }
 0x4ab   :  { %v443_v33 = vsel %vm440_vm11, %v442_v31, %v438_v32 }
 0x4ac   :  { %v444_v34 = vmul.f32 %v1105_v9, %v443_v33 }
 0x4ae   :  { %v452_v35 = vperm.slane %v444_v34, 1  ;;  %v445_v36 = vperm.slane %v444_v34, 0  ;;  %v469_v37 = vperm.slane %v444_v34, 2 }
 0x4b0   :  { %454 = vrot.lane.b32.xlu1 %v452_v35, %s1416_s6  ;;  %447 = vrot.lane.b32.xlu2 %v445_v36, %s1414_s27  ;;  %v470_v38 = vmul.f32 %v469_v37, %v1593_v25  ;;  %v471_v42 = vmul.f32 %v469_v37, %v1597_v27  ;;  %v487_v27 = vld [vmem:[%s1864_s8 + $0x10] sm:$0xff] }
 0x4b8   :  { %474 = vrot.lane.b32.xlu1 %v470_v38, %s1414_s27  ;;  %v621_v38 = vld [vmem:[%s1866_s10 + $0x18] sm:$0xff] }
 0x50a   :  { %v448_v43 = vpop.permute.xlu2 %447 }
 0x50b   :  { %v450_v44 = vmul.f32 %v448_v43, %v1581_v17  ;;  %v488_v17 = vld [vmem:[%s1864_s8 + $0x18] sm:$0xff] }
 0x50c   :  { %511 = vmatpush.msrb.mxu3 %v488_v17 }
 0x50e   :  { %512 = vmatpush.msrb.mxu3 %v487_v27 }
 0x522   :  { %v455_v39 = vpop.permute.xlu1 %454 }
 0x523   :  { %v457_v40 = vmul.f32 %v455_v39, %v1603_v30  ;;  %v458_v41 = vmul.f32 %v455_v39, %v1601_v29  ;;  %v451_v30 = vmul.f32 %v448_v43, %v1585_v19  ;;  %v486_v19 = vld [vmem:[%s1864_s8 + $0x8] sm:$0xff]  ;;  %v620_v39 = vld [vmem:[%s1866_s10 + $0x10] sm:$0xff] }
 0x524   :  { %513 = vmatpush.msrb.mxu3 %v486_v19 }
 0x525   :  { %461 = vrot.lane.b32.xlu0 %v457_v40, %s1416_s6  ;;  %463 = vrot.lane.b32.xlu2 %v458_v41, %s1416_s6  ;;  %v619_v40 = vld [vmem:[%s1866_s10 + $0x8] sm:$0xff]  ;;  %v618_v41 = vld [vmem:[%s1866_s10] sm:$0xff] }
 0x526   :  { %514 = vmatpush.msrb.mxu3 %v485_v53 }
 0x528   :  { %641 = vmatpush.msra.mxu3 %v621_v38 }
 0x52a   :  { %v475_v46 = vpop.permute.xlu1 %474  ;;  %642 = vmatpush.msra.mxu3 %v620_v39 }
 0x52c   :  { %643 = vmatpush.msra.mxu3 %v619_v40 }
 0x52d   :  { %476 = vrot.lane.b32.xlu0 %v471_v42, %s1414_s27 }
 0x52e   :  { %644 = vmatpush.msra.mxu3 %v618_v41 }
 0x535   :  { %557 = vrot.lane.b32.xlu0 %v1094_v56, %s1414_s27 }
 0x57f   :  { %v464_v48 = vpop.permute.xlu2 %463 }
 0x580   :  { %v468_v29 = vadd.f32 %v464_v48, %v451_v30 }
 0x597   :  { %v462_v45 = vpop.permute.xlu0 %461 }
 0x598   :  { %v467_v25 = vadd.f32 %v462_v45, %v450_v44 }
 0x59a   :  { %v480_v47 = vadd.f32 %v475_v46, %v467_v25  ;;  %v650_v25 = vld [vmem:[%s1868_s12] sm:$0xff] }
 0x59b   :  { %v1095_v46 = vld [vmem:[#allocation11] ss:$0 sm:$0xff] }
 0x59c   :  { %v482_v49 = vmax.f32 %v480_v47, 0.0 }
 0x59e   :  { %491 = vrot.lane.b32.xlu1 %v482_v49, %s1414_s27  ;;  %v1096_v49 = vld [vmem:[#allocation13] ss:$0 sm:$0xff] }
 0x59f   :  { %v477_v50 = vpop.permute.xlu0 %476 }
 0x5a0   :  { %v481_v51 = vadd.f32 %v477_v50, %v468_v29 }
 0x5a2   :  { %v483_v52 = vmax.f32 %v481_v51, 0.0 }
 0x5a4   :  { %493 = vrot.lane.b32.xlu2 %v483_v52, %s1414_s27 }
 0x5a7   :  { %v558_v62 = vpop.permute.xlu0 %557 }
 0x5fe   :  { %v1666_v55 = vpop.permute.xlu2 %493 }
 0x610   :  { %v1662_v54 = vpop.permute.xlu1 %491 }
 0x611   :  { %1061 = vmatmul.msk.f32.vlgmr.msrb.gmra.mxu3 %vm217_vm0, %v1662_v54 }
 0x619   :  { %1062 = vmatmul.msk.f32.gmra.mxu3 %vm217_vm0, %v1666_v55 }
 0x694   :  { %v516_v57 = vpop.f32.mrf.mxu3 }
 0x695   :  { %1108 = vtanh.f32 %v516_v57 }
 0x69b   :  { %v1109_v59 = vpop.eup %1108 }
 0x69c   :  { %v519_v58 = vpop.f32.mrf.mxu3 }
 0x69d   :  { %1110 = vtanh.f32 %v519_v58 }
 0x6a3   :  { %v1111_v60 = vpop.eup %1110 }
 0x6a4   :  { %v524_v61 = vpack.c.bf16 %v1111_v60, %v1109_v59 }
 0x6a6   :  { %532 = vmatpush.bf16.msrb.mxu0 %v524_v61 }
 0x6a9   :  { %1063 = vmatmul.msk.bf16.vlgmr.msrb.gmra.mxu0 %vm250_vm1, %v1577_v14 }
 0x6aa   :  { %673 = vmatpush.msra.mxu0 %v650_v25 }
 0x726   :  { %v534_v63 = vpop.f32.mrf.mxu0 }
 0x727   :  { %v1673_v0 = vadd.f32 %v558_v62, %v534_v63 }
 0x729   :  { %581 = vrot.lane.b32.xlu1 %v1673_v0, %s1414_s27 }
 0x72e   :  { %v536_v1 = vpop.f32.mrf.mxu0 }
 0x72f   :  { %v539_v2 = vpack.c.bf16 %v536_v1, %v534_v63  ;;  %v1677_v3 = vadd.f32 %v558_v62, %v536_v1 }
 0x731   :  { %583 = vrot.lane.b32.xlu2 %v1677_v3, %s1414_s27  ;;  %547 = vmatpush.bf16.msra.mxu1 %v539_v2 }
 0x734   :  { %1064 = vmatmul.msk.bf16.vlgmr.msra.gmra.mxu1 %vm250_vm1, %v1577_v14 }
 0x78b   :  { %v584_v18 = vpop.permute.xlu2 %583 }
 0x79b   :  { %v582_v11 = vpop.permute.xlu1 %581 }
 0x7b1   :  { %v549_v4 = vpop.f32.mrf.mxu1 }
 0x7b2   :  { %v1693_v12 = vadd.f32 %v1094_v56, %v549_v4 }
 0x7b4   :  { %v595_v16 = vsel %vm217_vm0, %v582_v11, %v1693_v12 }
 0x7b9   :  { %v551_v5 = vpop.f32.mrf.mxu1 }
 0x7ba   :  { %v554_v6 = vpack.c.bf16 %v551_v5, %v549_v4  ;;  %v1695_v13 = vadd.f32 %v1094_v56, %v551_v5 }
 0x7bc   :  { %572 = vmatpush.bf16.msra.mxu2 %v554_v6  ;;  %v596_v21 = vsel %vm217_vm0, %v584_v18, %v1695_v13 }
 0x7bf   :  { %1065 = vmatmul.msk.bf16.vlgmr.msra.gmra.mxu2 %vm250_vm1, %v1577_v14 }
 0x842   :  { %v574_v7 = vpop.f32.mrf.mxu2 }
 0x843   :  { %v1685_v8 = vadd.f32 %v574_v7, %v558_v62 }
 0x845   :  { %589 = vrot.lane.b32.xlu0 %v1685_v8, %s1414_s27 }
 0x84a   :  { %v576_v9 = vpop.f32.mrf.mxu2 }
 0x84b   :  { %v1689_v10 = vadd.f32 %v576_v9, %v558_v62 }
 0x84d   :  { %591 = vrot.lane.b32.xlu1 %v1689_v10, %s1414_s27 }
 0x8b7   :  { %v590_v15 = vpop.permute.xlu0 %589 }
 0x8b8   :  { %v597_v20 = vsel %vm326_vm2, %v595_v16, %v590_v15 }
 0x8b9   :  { %v599_v24 = vsel %vm329_vm3, %v597_v20, 0.0 }
 0x8bf   :  { %v592_v22 = vpop.permute.xlu1 %591 }
 0x8c0   :  { %v598_v23 = vsel %vm326_vm2, %v596_v21, %v592_v22 }
 0x8c1   :  { %v600_v26 = vsel %vm329_vm3, %v598_v23, 0.0 }
 0x8c2   :  { %v601_v28 = vadd.f32 %v600_v26, %v599_v24 }
 0x8c4   :  { %v602_v31 = vrot.slane %v601_v28, 4 }
 0x8c6   :  { %v603_v32 = vadd.f32 %v602_v31, %v601_v28 }
 0x8c8   :  { %v604_v33 = vrot.slane %v603_v32, 2 }
 0x8ca   :  { %v605_v34 = vadd.f32 %v604_v33, %v603_v32 }
 0x8cc   :  { %v606_v35 = vrot.slane %v605_v34, 1 }
 0x8ce   :  { %v607_v36 = vadd.f32 %v606_v35, %v605_v34 }
 0x8d0   :  { %v608_v37 = vmul.f32 0.0625, %v607_v36 }
 0x8d2   :  { %613 = vrot.lane.b32.xlu0 %v608_v37, %s1414_s27  ;;  %610 = vrot.lane.b32.xlu2 %v608_v37, %s1415_s0 }
 0x92c   :  { %v611_v42 = vpop.permute.xlu2 %610 }
 0x92d   :  { %v616_v43 = vsel %vm347_vm4, %v608_v37, %v611_v42 }
 0x944   :  { %v614_v44 = vpop.permute.xlu0 %613 }
 0x945   :  { %v617_v45 = vsel %vm349_vm5, %v616_v43, %v614_v44  ;;  %v752_v43 = vld [vmem:[%s1870_s14 + $0x10] sm:$0xff]  ;;  %v751_v44 = vld [vmem:[%s1870_s14 + $0x8] sm:$0xff] }
 0x946   :  { %1066 = vmatmul.msk.f32.vlgmr.msra.gmra.mxu3 %vm217_vm0, %v617_v45  ;;  %v750_v45 = vld [vmem:[%s1870_s14] sm:$0xff] }
 0x9c9   :  { %v646_v47 = vpop.f32.mrf.mxu3 }
 0x9ca   :  { %v647_v48 = vadd.f32 %v1095_v46, %v646_v47  ;;  %v1097_v47 = vld [vmem:[#allocation14] ss:$0 sm:$0xff] }
 0x9cc   :  { %v649_v30 = vmax.f32 %v647_v48, 0.0 }
 0x9ce   :  { %1067 = vmatmul.msk.f32.vlgmr.msra.gmra.mxu0 %vm388_vm6, %v649_v30 }
 0xa4b   :  { %v675_v29 = vpop.f32.mrf.mxu0 }
 0xa4c   :  { %v676_v50 = vadd.f32 %v1096_v49, %v675_v29 }
 0xa4e   :  { %v678_v51 = vsel %vm412_vm7, %v676_v50, -inf }
 0xa4f   :  { %v679_v52 = vrot.slane %v678_v51, 4 }
 0xa51   :  { %v680_v17 = vmax.f32 %v678_v51, %v679_v52 }
 0xa53   :  { %v681_v27 = vrot.slane %v680_v17, 2 }
 0xa55   :  { %v682_v19 = vmax.f32 %v680_v17, %v681_v27 }
 0xa57   :  { %v683_v53 = vrot.slane %v682_v19, 1 }
 0xa59   :  { %v684_v56 = vmax.f32 %v682_v19, %v683_v53 }
 0xa5b   :  { %v685_v57 = vsub.f32 %v676_v50, %v684_v56 }
 0xa5d   :  { %v686_v58 = vmul.f32 1.442695, %v685_v57 }
 0xa5f   :  { %1112 = vpow2.f32 %v686_v58 }
 0xa65   :  { %v1113_v59 = vpop.eup %1112 }
 0xa66   :  { %v688_v60 = vsel %vm412_vm7, %v1113_v59, 0.0 }
 0xa67   :  { %v689_v61 = vrot.slane %v688_v60, 4 }
 0xa69   :  { %v690_v62 = vadd.f32 %v689_v61, %v688_v60 }
 0xa6b   :  { %v691_v63 = vrot.slane %v690_v62, 2 }
 0xa6d   :  { %v692_v1 = vadd.f32 %v691_v63, %v690_v62 }
 0xa6f   :  { %v693_v2 = vrot.slane %v692_v1, 1 }
 0xa71   :  { %v694_v4 = vadd.f32 %v693_v2, %v692_v1 }
 0xa73   :  { %1114 = vrcp.f32 %v694_v4  ;;  %v706_v9 = vand.u32 2147483648, %v694_v4  ;;  %v704_v15 = vand.u32 2147483647, %v694_v4  ;;  %vm700_vm13 = vweird.f32 %v694_v4 }
 0xa75   :  { %v707_v18 = vor.u32 1.1754944e-38, %v706_v9  ;;  %vm705_vm15 = vcmp.eq.f32.partialorder %v704_v15, 8.507059e+37 }
 0xa79   :  { %v1115_v5 = vpop.eup %1114 }
 0xa7a   :  { %v696_v6 = vmul.f32 %v1115_v5, %v694_v4  ;;  %vm701_vm12 = vweird.f32 %v1115_v5 }
 0xa7b   :  { %vm702_vm14 = vmor %vm700_vm13, %vm701_vm12 }
 0xa7c   :  { %v697_v7 = vsub.f32 1.0, %v696_v6 }
 0xa7e   :  { %v698_v11 = vmul.f32 %v1115_v5, %v697_v7 }
 0xa80   :  { %v699_v16 = vadd.f32 %v1115_v5, %v698_v11 }
 0xa82   :  { %v703_v20 = vsel %vm702_vm14, %v1115_v5, %v699_v16 }
 0xa83   :  { %v708_v21 = vsel %vm705_vm15, %v707_v18, %v703_v20 }
 0xa84   :  { %v709_v22 = vmul.f32 %v1113_v59, %v708_v21 }
 0xa86   :  { %v717_v23 = vperm.slane %v709_v22, 1  ;;  %v710_v24 = vperm.slane %v709_v22, 0  ;;  %v734_v26 = vperm.slane %v709_v22, 2 }
 0xa88   :  { %719 = vrot.lane.b32.xlu1 %v717_v23, %s1416_s6  ;;  %712 = vrot.lane.b32.xlu2 %v710_v24, %s1414_s27  ;;  %v735_v28 = vmul.f32 %v734_v26, %v1685_v8  ;;  %v736_v34 = vmul.f32 %v734_v26, %v1689_v10 }
 0xa90   :  { %739 = vrot.lane.b32.xlu1 %v735_v28, %s1414_s27 }
 0xae2   :  { %v713_v35 = vpop.permute.xlu2 %712 }
 0xae3   :  { %v715_v36 = vmul.f32 %v713_v35, %v1673_v0 }
 0xafa   :  { %v720_v31 = vpop.permute.xlu1 %719 }
 0xafb   :  { %v722_v32 = vmul.f32 %v720_v31, %v1693_v12  ;;  %v723_v33 = vmul.f32 %v720_v31, %v1695_v13  ;;  %v716_v12 = vmul.f32 %v713_v35, %v1677_v3  ;;  %v753_v3 = vld [vmem:[%s1870_s14 + $0x18] sm:$0xff] }
 0xafc   :  { %776 = vmatpush.msrb.mxu1 %v753_v3  ;;  %v886_v31 = vld [vmem:[%s1872_s16 + $0x18] sm:$0xff]  ;;  %v1099_v3 = vld [vmem:[#allocation17] ss:$0 sm:$0xff] }
 0xafd   :  { %726 = vrot.lane.b32.xlu0 %v722_v32, %s1416_s6  ;;  %728 = vrot.lane.b32.xlu2 %v723_v33, %s1416_s6  ;;  %v885_v32 = vld [vmem:[%s1872_s16 + $0x10] sm:$0xff]  ;;  %v884_v33 = vld [vmem:[%s1872_s16 + $0x8] sm:$0xff] }
 0xafe   :  { %777 = vmatpush.msrb.mxu1 %v752_v43 }
 0xb00   :  { %778 = vmatpush.msrb.mxu1 %v751_v44 }
 0xb02   :  { %v740_v38 = vpop.permute.xlu1 %739  ;;  %779 = vmatpush.msrb.mxu1 %v750_v45 }
 0xb04   :  { %906 = vmatpush.msra.mxu1 %v886_v31 }
 0xb05   :  { %741 = vrot.lane.b32.xlu0 %v736_v34, %s1414_s27  ;;  %v883_v34 = vld [vmem:[%s1872_s16] sm:$0xff]  ;;  %s1417_s16 = smov [#allocation19]  }
 0xb06   :  { %907 = vmatpush.msra.mxu1 %v885_v32 }
 0xb08   :  { %908 = vmatpush.msra.mxu1 %v884_v33 }
 0xb0a   :  { %909 = vmatpush.msra.mxu1 %v883_v34 }
 0xb0d   :  { %822 = vrot.lane.b32.xlu0 %v1097_v47, %s1414_s27 }
 0xb57   :  { %v729_v40 = vpop.permute.xlu2 %728 }
 0xb58   :  { %v733_v41 = vadd.f32 %v729_v40, %v716_v12  ;;  %v1098_v40 = vld [vmem:[#allocation16] ss:$0 sm:$0xff] }
 0xb6f   :  { %v727_v37 = vpop.permute.xlu0 %726 }
 0xb70   :  { %v732_v8 = vadd.f32 %v727_v37, %v715_v36 }
 0xb72   :  { %v1739_v39 = vadd.f32 %v740_v38, %v732_v8  ;;  %v915_v38 = vld [vmem:[%s1874_s18] sm:$0xff]  ;;  %s1034_s18 = sshll.u32 %s1417_s16, 4  ;;  %s1035_s18 = int_to_ptr.vmem [resolvable:$true] %s1034_s18 }
 0xb74   :  { %v747_v13 = vmax.f32 %v1739_v39, 0.0 }
 0xb76   :  { %756 = vrot.lane.b32.xlu1 %v747_v13, %s1414_s27 }
 0xb77   :  { %v742_v10 = vpop.permute.xlu0 %741 }
 0xb78   :  { %v1746_v42 = vadd.f32 %v742_v10, %v733_v41 }
 0xb7a   :  { %v748_v0 = vmax.f32 %v1746_v42, 0.0 }
 0xb7c   :  { %758 = vrot.lane.b32.xlu2 %v748_v0, %s1414_s27 }
 0xb7f   :  { %v823_v51 = vpop.permute.xlu0 %822 }
 0xbd6   :  { %v759_v46 = vpop.permute.xlu2 %758 }
 0xbe8   :  { %v757_v25 = vpop.permute.xlu1 %756 }
 0xbe9   :  { %1068 = vmatmul.msk.f32.vlgmr.msrb.gmra.mxu1 %vm217_vm0, %v757_v25 }
 0xbf1   :  { %1069 = vmatmul.msk.f32.gmra.mxu1 %vm217_vm0, %v759_v46 }
 0xc66   :  { %v781_v48 = vpop.f32.mrf.mxu1 }
 0xc67   :  { %1116 = vtanh.f32 %v781_v48 }
 0xc6d   :  { %v1117_v49 = vpop.eup %1116 }
 0xc6e   :  { %v784_v30 = vpop.f32.mrf.mxu1 }
 0xc6f   :  { %1118 = vtanh.f32 %v784_v30 }
 0xc75   :  { %v1119_v29 = vpop.eup %1118 }
 0xc76   :  { %v789_v50 = vpack.c.bf16 %v1119_v29, %v1117_v49 }
 0xc78   :  { %797 = vmatpush.bf16.msrb.mxu2 %v789_v50 }
 0xc7b   :  { %1070 = vmatmul.msk.bf16.vlgmr.msrb.gmra.mxu2 %vm250_vm1, %v1577_v14 }
 0xc7c   :  { %938 = vmatpush.msra.mxu2 %v915_v38 }
 0xcfe   :  { %v799_v52 = vpop.f32.mrf.mxu2 }
 0xcff   :  { %v1769_v17 = vadd.f32 %v823_v51, %v799_v52 }
 0xd01   :  { %846 = vrot.lane.b32.xlu1 %v1769_v17, %s1414_s27 }
 0xd06   :  { %v801_v27 = vpop.f32.mrf.mxu2 }
 0xd07   :  { %v804_v19 = vpack.c.bf16 %v801_v27, %v799_v52  ;;  %v1773_v53 = vadd.f32 %v823_v51, %v801_v27 }
 0xd09   :  { %848 = vrot.lane.b32.xlu2 %v1773_v53, %s1414_s27  ;;  %812 = vmatpush.bf16.msrb.mxu3 %v804_v19 }
 0xd0c   :  { %1071 = vmatmul.msk.bf16.vlgmr.msrb.gmra.mxu3 %vm250_vm1, %v1577_v14 }
 0xd63   :  { %v849_v5 = vpop.permute.xlu2 %848 }
 0xd73   :  { %v847_v63 = vpop.permute.xlu1 %846 }
 0xd8f   :  { %v814_v56 = vpop.f32.mrf.mxu3 }
 0xd90   :  { %v1789_v1 = vadd.f32 %v1097_v47, %v814_v56 }
 0xd97   :  { %v816_v57 = vpop.f32.mrf.mxu3 }
 0xd98   :  { %v819_v58 = vpack.c.bf16 %v816_v57, %v814_v56  ;;  %v1791_v2 = vadd.f32 %v1097_v47, %v816_v57 }
 0xd9a   :  { %837 = vmatpush.bf16.msrb.mxu0 %v819_v58  ;;  %v861_v7 = vsel %vm217_vm0, %v849_v5, %v1791_v2 }
 0xd9d   :  { %1072 = vmatmul.msk.bf16.vlgmr.msrb.gmra.mxu0 %vm250_vm1, %v1577_v14  ;;  %v860_v14 = vsel %vm217_vm0, %v847_v63, %v1789_v1 }
 0xe1a   :  { %v839_v59 = vpop.f32.mrf.mxu0 }
 0xe1b   :  { %v1781_v60 = vadd.f32 %v839_v59, %v823_v51 }
 0xe1d   :  { %854 = vrot.lane.b32.xlu0 %v1781_v60, %s1414_s27 }
 0xe22   :  { %v841_v61 = vpop.f32.mrf.mxu0 }
 0xe23   :  { %v1785_v62 = vadd.f32 %v841_v61, %v823_v51 }
 0xe25   :  { %856 = vrot.lane.b32.xlu1 %v1785_v62, %s1414_s27 }
 0xe8f   :  { %v855_v4 = vpop.permute.xlu0 %854 }
 0xe90   :  { %v862_v6 = vsel %vm326_vm2, %v860_v14, %v855_v4 }
 0xe91   :  { %v864_v15 = vsel %vm329_vm3, %v862_v6, 0.0 }
 0xe97   :  { %v857_v9 = vpop.permute.xlu1 %856 }
 0xe98   :  { %v863_v11 = vsel %vm326_vm2, %v861_v7, %v857_v9 }
 0xe99   :  { %v865_v16 = vsel %vm329_vm3, %v863_v11, 0.0 }
 0xe9a   :  { %v866_v18 = vadd.f32 %v865_v16, %v864_v15 }
 0xe9c   :  { %v867_v20 = vrot.slane %v866_v18, 4 }
 0xe9e   :  { %v868_v21 = vadd.f32 %v867_v20, %v866_v18 }
 0xea0   :  { %v869_v22 = vrot.slane %v868_v21, 2 }
 0xea2   :  { %v870_v23 = vadd.f32 %v869_v22, %v868_v21 }
 0xea4   :  { %v871_v24 = vrot.slane %v870_v23, 1 }
 0xea6   :  { %v872_v26 = vadd.f32 %v871_v24, %v870_v23 }
 0xea8   :  { %v873_v28 = vmul.f32 0.0625, %v872_v26 }
 0xeaa   :  { %878 = vrot.lane.b32.xlu0 %v873_v28, %s1414_s27  ;;  %875 = vrot.lane.b32.xlu2 %v873_v28, %s1415_s0 }
 0xf04   :  { %v876_v35 = vpop.permute.xlu2 %875 }
 0xf05   :  { %v881_v36 = vsel %vm347_vm4, %v873_v28, %v876_v35 }
 0xf1c   :  { %v879_v37 = vpop.permute.xlu0 %878 }
 0xf1d   :  { %v882_v8 = vsel %vm349_vm5, %v881_v36, %v879_v37 }
 0xf1e   :  { %1073 = vmatmul.msk.f32.vlgmr.msra.gmra.mxu1 %vm217_vm0, %v882_v8 }
 0xf9b   :  { %v911_v12 = vpop.f32.mrf.mxu1 }
 0xf9c   :  { %v912_v41 = vadd.f32 %v1098_v40, %v911_v12 }
 0xf9e   :  { %v914_v10 = vmax.f32 %v912_v41, 0.0 }
 0xfa0   :  { %1074 = vmatmul.msk.f32.vlgmr.msra.gmra.mxu2 %vm388_vm6, %v914_v10 }
0x1023   :  { %v940_v43 = vpop.f32.mrf.mxu2 }
0x1024   :  { %v941_v44 = vadd.f32 %v1099_v3, %v940_v43 }
0x1026   :  { %v943_v45 = vsel %vm412_vm7, %v941_v44, -inf }
0x1027   :  { %v944_v25 = vrot.slane %v943_v45, 4 }
0x1029   :  { %v945_v46 = vmax.f32 %v943_v45, %v944_v25 }
0x102b   :  { %v946_v47 = vrot.slane %v945_v46, 2 }
0x102d   :  { %v947_v48 = vmax.f32 %v945_v46, %v946_v47 }
0x102f   :  { %v948_v30 = vrot.slane %v947_v48, 1 }
0x1031   :  { %v949_v49 = vmax.f32 %v947_v48, %v948_v30 }
0x1033   :  { %v950_v29 = vsub.f32 %v941_v44, %v949_v49 }
0x1035   :  { %v951_v50 = vmul.f32 1.442695, %v950_v29 }
0x1037   :  { %1120 = vpow2.f32 %v951_v50 }
0x103d   :  { %v1121_v51 = vpop.eup %1120 }
0x103e   :  { %v953_v52 = vsel %vm412_vm7, %v1121_v51, 0.0 }
0x103f   :  { %v954_v27 = vrot.slane %v953_v52, 4 }
0x1041   :  { %v955_v19 = vadd.f32 %v954_v27, %v953_v52 }
0x1043   :  { %v956_v56 = vrot.slane %v955_v19, 2 }
0x1045   :  { %v957_v57 = vadd.f32 %v956_v56, %v955_v19 }
0x1047   :  { %v958_v58 = vrot.slane %v957_v57, 1 }
0x1049   :  { %v959_v59 = vadd.f32 %v958_v58, %v957_v57 }
0x104b   :  { %1122 = vrcp.f32 %v959_v59  ;;  %v971_v14 = vand.u32 2147483648, %v959_v59  ;;  %v969_v6 = vand.u32 2147483647, %v959_v59  ;;  %vm965_vm4 = vweird.f32 %v959_v59 }
0x104d   :  { %v972_v9 = vor.u32 1.1754944e-38, %v971_v14  ;;  %vm970_vm6 = vcmp.eq.f32.partialorder %v969_v6, 8.507059e+37 }
0x1051   :  { %v1123_v61 = vpop.eup %1122 }
0x1052   :  { %v961_v63 = vmul.f32 %v1123_v61, %v959_v59  ;;  %vm966_vm1 = vweird.f32 %v1123_v61 }
0x1053   :  { %vm967_vm5 = vmor %vm965_vm4, %vm966_vm1 }
0x1054   :  { %v962_v4 = vsub.f32 1.0, %v961_v63 }
0x1056   :  { %v963_v5 = vmul.f32 %v1123_v61, %v962_v4 }
0x1058   :  { %v964_v7 = vadd.f32 %v1123_v61, %v963_v5 }
0x105a   :  { %v968_v11 = vsel %vm967_vm5, %v1123_v61, %v964_v7 }
0x105b   :  { %v973_v15 = vsel %vm970_vm6, %v972_v9, %v968_v11 }
0x105c   :  { %v974_v16 = vmul.f32 %v1121_v51, %v973_v15 }
0x105e   :  { %v982_v18 = vperm.slane %v974_v16, 1  ;;  %v975_v20 = vperm.slane %v974_v16, 0  ;;  %v999_v21 = vperm.slane %v974_v16, 2 }
0x1060   :  { %984 = vrot.lane.b32.xlu1 %v982_v18, %s1416_s6  ;;  %977 = vrot.lane.b32.xlu2 %v975_v20, %s1414_s27  ;;  %v1000_v22 = vmul.f32 %v999_v21, %v1781_v60  ;;  %v1001_v28 = vmul.f32 %v999_v21, %v1785_v62 }
0x1068   :  { %1004 = vrot.lane.b32.xlu2 %v1000_v22, %s1414_s27 }
0x1070   :  { %1018 = vrot.lane.b32.xlu2 %v748_v0, %s1415_s0 }
0x10ba   :  { %v978_v60 = vpop.permute.xlu2 %977 }
0x10bb   :  { %v980_v42 = vmul.f32 %v978_v60, %v1769_v17  ;;  %v981_v33 = vmul.f32 %v978_v60, %v1773_v53 }
0x10c2   :  { %v1005_v0 = vpop.permute.xlu2 %1004 }
0x10ca   :  { %v1019_v37 = vpop.permute.xlu2 %1018 }
0x10cb   :  { %v1023_v38 = vsel %vm217_vm0, %v1666_v55, %v1019_v37 }
0x10d2   :  { %v985_v23 = vpop.permute.xlu1 %984 }
0x10d3   :  { %v987_v24 = vmul.f32 %v985_v23, %v1789_v1  ;;  %v988_v26 = vmul.f32 %v985_v23, %v1791_v2 }
0x10d5   :  { %993 = vrot.lane.b32.xlu1 %v988_v26, %s1416_s6  ;;  %991 = vrot.lane.b32.xlu0 %v987_v24, %s1416_s6  ;;  %s1036_s6 = sshll.u32 %s1876_s20, 4  ;;  %s1037_s6 = int_to_ptr.hbm [resolvable:$true] %s1036_s6 }
0x10dd   :  { %1016 = vrot.lane.b32.xlu1 %v747_v13, %s1415_s0  ;;  %1006 = vrot.lane.b32.xlu0 %v1001_v28, %s1414_s27 }
0x1147   :  { %v994_v31 = vpop.permute.xlu1 %993  ;;  %v992_v1 = vpop.permute.xlu0 %991 }
0x1148   :  { %v997_v32 = vadd.f32 %v992_v1, %v980_v42  ;;  %v998_v34 = vadd.f32 %v994_v31, %v981_v33 }
0x114a   :  { %v1010_v2 = vadd.f32 %v1005_v0, %v997_v32 }
0x114c   :  { %v1012_v35 = vmax.f32 %v1010_v2, 0.0 }
0x114f   :  { %v1017_v36 = vpop.permute.xlu1 %1016  ;;  %v1007_v62 = vpop.permute.xlu0 %1006 }
0x1150   :  { %v1022_v39 = vsel %vm217_vm0, %v1662_v54, %v1017_v36  ;;  %v1011_v13 = vadd.f32 %v1007_v62, %v998_v34 }
0x1151   :  { %v1024_v8 = vsel %vm326_vm2, %v1022_v39, %v1012_v35 }
0x1152   :  { %v1026_v17 = vsel %vm329_vm3, %v1024_v8, 0.0  ;;  %v1013_v53 = vmax.f32 %v1011_v13, 0.0 }
0x1153   :  { %1028 = vst [vmem:[#allocation19] sm:$0xff] %v1026_v17 }
0x1154   :  { %v1025_v40 = vsel %vm326_vm2, %v1023_v38, %v1013_v53 }
0x1155   :  { %v1027_v54 = vsel %vm329_vm3, %v1025_v40, 0.0 }
0x1156   :  { %1029 = vst [vmem:[#allocation19 + $0x8] sm:$0xff] %v1027_v54 }
0x1157   :  { %1042 = dma.vmem_to_hbm [thread:$0]  %s1035_s18, 256, %s1037_s6, [#allocation4], %s1891_s22, %s1891_s22, %s1890_s21  }
0x1158   :  { %1400 = dma.done.wait [#allocation4], 256  }
0x1159   :  { %1401 = vsyncadd [#allocation4], 4294967040 }
0x115a   :  { %1047 = vsyncpa [#allocation3], 1 }
0x115b   :  { %1048 = vsyncpa [#allocation6], 1 }
0x115c   :  { %1049 = vsyncpa [#allocation9], 1 }
0x115d   :  { %1050 = vsyncpa [#allocation12], 1 }
0x115e   :  { %1051 = vsyncpa [#allocation15], 1 }
0x115f   :  { %1052 = vsyncpa [#allocation18], 1 }
0x1160   :  { %1053 = vsyncpa [#allocation4], 1 }

</bundles_post_ra>
